<compile_context>
chip_gen: v6e
topology: v6e:2x2x1
jax: 0.10.0
libtpu: 0.0.40
codegen_flags: <defaults>
</compile_context>

<pallas_src>
import functools

import numpy as np
import jax
import jax.numpy as jnp
from jax.experimental import pallas as pl
from jax.experimental.pallas import tpu as pltpu


# ----------------------------------------------------------------------------
# Pallas kernels
# ----------------------------------------------------------------------------
def _linear_kernel(x_ref, w_ref, b_ref, o_ref, *, relu):
    # (tm, K) @ (K, N) on the MXU, f32 accumulate, bias + optional ReLU fused.
    acc = jnp.dot(x_ref[...], w_ref[...], preferred_element_type=jnp.float32)
    acc = acc + b_ref[...]  # (1, N) broadcast over rows
    if relu:
        acc = jnp.maximum(acc, 0.0)
    # Partial last blocks: garbage rows flow through the matmul but the store
    # is masked by Pallas, so only valid rows reach HBM.
    o_ref[...] = acc.astype(o_ref.dtype)


def _fc_fused_kernel(x_ref, w1_ref, b1_ref, w2_ref, b2_ref, o_ref):
    # h = relu(x @ W1 + b1) stays in VMEM/vregs; y = h @ W2 + b2.
    h = jnp.dot(x_ref[...], w1_ref[...], preferred_element_type=jnp.float32)
    h = jnp.maximum(h + b1_ref[...], 0.0)
    y = jnp.dot(h.astype(w2_ref.dtype), w2_ref[...],
                preferred_element_type=jnp.float32)
    o_ref[...] = (y + b2_ref[...]).astype(o_ref.dtype)


# ----------------------------------------------------------------------------
# Tiling helper: biggest tile <= block_m that still gives >= 2 grid steps
# (v7x megacore) and keeps the sublane dim 8-aligned.
# ----------------------------------------------------------------------------
def _row_tile(M, block_m):
    if M <= 8:
        return M                      # full-dim block (always legal)
    return min(block_m, 8 * pl.cdiv(pl.cdiv(M, 2), 8))


def _nbytes(arr):
    return int(arr.size) * int(arr.dtype.itemsize)


# ----------------------------------------------------------------------------
# Pallas wrappers (tiled over rows, weights replicated / VMEM-resident)
# ----------------------------------------------------------------------------
def pallas_linear(x, w, b, *, relu, out_dtype, block_m=1024):
    """y = relu?(x @ w + b); x:(M,K) bf16, w:(K,N) bf16, b:(N,) f32."""
    M, K = x.shape
    K2, N = w.shape
    assert K == K2
    b2 = b.reshape(1, N).astype(jnp.float32)
    tm = _row_tile(M, block_m)
    cost = pl.CostEstimate(
        flops=2 * M * K * N,
        transcendentals=0,
        bytes_accessed=_nbytes(x) + _nbytes(w) + _nbytes(b2)
        + M * N * int(np.dtype(out_dtype).itemsize))
    return pl.pallas_call(
        functools.partial(_linear_kernel, relu=relu),
        out_shape=jax.ShapeDtypeStruct((M, N), out_dtype),
        grid=(pl.cdiv(M, tm),),
        in_specs=[
            pl.BlockSpec((tm, K), lambda i: (i, 0)),
            pl.BlockSpec((K, N), lambda i: (0, 0)),
            pl.BlockSpec((1, N), lambda i: (0, 0)),
        ],
        out_specs=pl.BlockSpec((tm, N), lambda i: (i, 0)),
        compiler_params=pltpu.CompilerParams(
            dimension_semantics=("parallel",)),
        cost_estimate=cost,
    )(x, w, b2)


def pallas_fc_fused(x, w1, b1, w2, b2, *, block_m=256):
    """y = relu(x @ w1 + b1) @ w2 + b2 in one kernel; x:(M,K) bf16."""
    M, K = x.shape
    K1, H = w1.shape
    H2, N = w2.shape
    assert K == K1 and H == H2
    b1r = b1.reshape(1, H).astype(jnp.float32)
    b2r = b2.reshape(1, N).astype(jnp.float32)
    tm = _row_tile(M, block_m)
    cost = pl.CostEstimate(
        flops=2 * M * K * H + 2 * M * H * N,
        transcendentals=0,
        bytes_accessed=_nbytes(x) + _nbytes(w1) + _nbytes(b1r)
        + _nbytes(w2) + _nbytes(b2r) + M * N * 4)
    return pl.pallas_call(
        _fc_fused_kernel,
        out_shape=jax.ShapeDtypeStruct((M, N), jnp.float32),
        grid=(pl.cdiv(M, tm),),
        in_specs=[
            pl.BlockSpec((tm, K), lambda i: (i, 0)),
            pl.BlockSpec((K, H), lambda i: (0, 0)),
            pl.BlockSpec((1, H), lambda i: (0, 0)),
            pl.BlockSpec((H, N), lambda i: (0, 0)),
            pl.BlockSpec((1, N), lambda i: (0, 0)),
        ],
        out_specs=pl.BlockSpec((tm, N), lambda i: (i, 0)),
        compiler_params=pltpu.CompilerParams(
            dimension_semantics=("parallel",)),
        cost_estimate=cost,
    )(x, w1, b1r, w2, b2r)


# ----------------------------------------------------------------------------
# XLA glue: NHWC im2col via static strided slices (no transposes, no gathers)
# ----------------------------------------------------------------------------
def _im2col_nhwc(x, kh, kw, stride):
    """x: (B, H, W, C) -> patches (B*oh*ow, kh*kw*C), features in (kh,kw,C) order."""
    B, H, W, C = x.shape
    oh = (H - kh) // stride + 1
    ow = (W - kw) // stride + 1
    cols = []
    for dh in range(kh):
        for dw in range(kw):
            cols.append(
                x[:, dh:dh + (oh - 1) * stride + 1:stride,
                     dw:dw + (ow - 1) * stride + 1:stride, :])  # (B, oh, ow, C)
    p = jnp.stack(cols, axis=3)  # (B, oh, ow, kh*kw, C)
    return p.reshape(B * oh * ow, kh * kw * C), oh, ow


# ----------------------------------------------------------------------------
# Parameter init (PyTorch layout) and one-time kernel-ready prep
# ----------------------------------------------------------------------------
def init_params(key, in_channels, out_channels):
    ks = jax.random.split(key, 8)

    def u(k, shape, fan_in):
        bound = 1.0 / jnp.sqrt(jnp.float32(fan_in))
        return jax.random.uniform(k, shape, jnp.float32, -bound, bound)

    return {
        "conv1_w": u(ks[0], (16, in_channels, 8, 8), in_channels * 8 * 8),
        "conv1_b": u(ks[1], (16,), in_channels * 8 * 8),
        "conv2_w": u(ks[2], (32, 16, 4, 4), 16 * 4 * 4),
        "conv2_b": u(ks[3], (32,), 16 * 4 * 4),
        "fc1_w": u(ks[4], (32 * 9 * 9, 256), 32 * 9 * 9),   # (in, out) layout
        "fc1_b": u(ks[5], (256,), 32 * 9 * 9),
        "fc2_w": u(ks[6], (256, out_channels), 256),
        "fc2_b": u(ks[7], (out_channels,), 256),
    }


def prepare_params(params):
    """One-time reshape/permute/cast of PyTorch-layout weights to kernel layout."""
    c_in = params["conv1_w"].shape[1]
    # Conv weights: (C_out, C_in, kh, kw) -> (kh*kw*C_in, C_out), matching the
    # (kh, kw, C) feature order produced by _im2col_nhwc.
    w1 = jnp.transpose(params["conv1_w"], (2, 3, 1, 0)).reshape(8 * 8 * c_in, 16)
    w2 = jnp.transpose(params["conv2_w"], (2, 3, 1, 0)).reshape(4 * 4 * 16, 32)
    # fc1 rows are indexed (c, h, w) by the PyTorch channel-major flatten; our
    # NHWC flatten is (h, w, c)-major, so permute the weight rows once instead
    # of transposing activations every step.
    w3 = (params["fc1_w"].reshape(32, 9, 9, 256)
          .transpose(1, 2, 0, 3).reshape(32 * 9 * 9, 256))
    return {
        "w1": w1.astype(jnp.bfloat16), "b1": params["conv1_b"].astype(jnp.float32),
        "w2": w2.astype(jnp.bfloat16), "b2": params["conv2_b"].astype(jnp.float32),
        "w3": w3.astype(jnp.bfloat16), "b3": params["fc1_b"].astype(jnp.float32),
        "w4": params["fc2_w"].astype(jnp.bfloat16),
        "b4": params["fc2_b"].astype(jnp.float32),
    }


# ----------------------------------------------------------------------------
# Forward pass (semantics of CNN.forward)
# ----------------------------------------------------------------------------
@jax.jit
def cnn_forward(p, x):
    B = x.shape[0]
    # Single required layout change: NCHW input -> NHWC, cast to bf16.
    # NOTE: bf16 operands deviate from the f32 PyTorch reference by ~1e-2 rel;
    # acceptable for DQN, accumulation stays f32.
    h = jnp.transpose(x, (0, 2, 3, 1)).astype(jnp.bfloat16)

    # conv1: k=8, s=4, 16 ch, + ReLU   (rows = B*20*20, K = 8*8*C_in)
    patches, oh, ow = _im2col_nhwc(h, 8, 8, 4)
    y = pallas_linear(patches, p["w1"], p["b1"], relu=True,
                      out_dtype=jnp.bfloat16, block_m=1024)
    h = y.reshape(B, oh, ow, 16)

    # conv2: k=4, s=2, 32 ch, + ReLU   (rows = B*9*9, K = 4*4*16)
    patches, oh, ow = _im2col_nhwc(h, 4, 4, 2)
    y = pallas_linear(patches, p["w2"], p["b2"], relu=True,
                      out_dtype=jnp.bfloat16, block_m=1024)

    # (h, w, c)-major flatten (free row-major reshape); fc1 weight rows were
    # pre-permuted to match the PyTorch channel-major `.view(-1, 32*9*9)`.
    feats = y.reshape(B, oh * ow * 32)

    # fc1 + ReLU + fc2, fused in one Pallas kernel.
    return pallas_fc_fused(feats, p["w3"], p["b3"], p["w4"], p["b4"])


if __name__ == "__main__":
    key = jax.random.PRNGKey(0)
    kp, kx = jax.random.split(key)
    in_channels, out_channels = 4, 6
    batch = 2
    x = jax.random.normal(kx, (batch, in_channels, 84, 84), jnp.float32)
    params = init_params(kp, in_channels, out_channels)
    prepared = prepare_params(params)  # one-time weight permute/cast
    y = cnn_forward(prepared, x)
    jax.block_until_ready(y)
    assert y.shape == (batch, out_channels)
    assert y.dtype == jnp.float32
    print("KERNEL_OK")
</pallas_src>

<mosaic_0001>
module attributes {stable_mosaic.version = 11 : i64} {
  func.func @_linear_kernel(%arg0: i32, %arg1: memref<400x256xbf16, #tpu.memory_space<vmem>>, %arg2: memref<256x16xbf16, #tpu.memory_space<vmem>>, %arg3: memref<1x16xf32, #tpu.memory_space<vmem>>, %arg4: memref<400x16xbf16, #tpu.memory_space<vmem>>) attributes {dimension_semantics = [#tpu.dimension_semantics<parallel>], iteration_bounds = array<i64: 2>, scalar_prefetch = 0 : i64, scratch_operands = 0 : i64, tpu.core_type = #tpu.core_type<tc>, window_params = [{transform_indices = @transform_0, window_bounds = array<i64: 400, 256>}, {pipeline_mode = #tpu.pipeline_mode<synchronous>, transform_indices = @transform_1, window_bounds = array<i64: 256, 16>}, {pipeline_mode = #tpu.pipeline_mode<synchronous>, transform_indices = @transform_2, window_bounds = array<i64: 1, 16>}, {transform_indices = @transform_3, window_bounds = array<i64: 400, 16>}]} {
    %c0 = arith.constant 0 : index
    %c0_0 = arith.constant 0 : index
    %0 = vector.load %arg1[%c0, %c0_0] : memref<400x256xbf16, #tpu.memory_space<vmem>>, vector<400x256xbf16>
    %c0_1 = arith.constant 0 : index
    %c0_2 = arith.constant 0 : index
    %1 = vector.load %arg2[%c0_1, %c0_2] : memref<256x16xbf16, #tpu.memory_space<vmem>>, vector<256x16xbf16>
    %cst = arith.constant dense<0.000000e+00> : vector<400x16xf32>
    %2 = tpu.matmul %0, %1, %cst {dimension_numbers = #tpu.dot_dimension_numbers<[1], [0], [0], [1], [0, 0, 1, 1], [], []>} : vector<400x256xbf16>, vector<256x16xbf16>, vector<400x16xf32> -> vector<400x16xf32>
    %c0_3 = arith.constant 0 : index
    %c0_4 = arith.constant 0 : index
    %3 = vector.load %arg3[%c0_3, %c0_4] : memref<1x16xf32, #tpu.memory_space<vmem>>, vector<1x16xf32>
    %4 = vector.broadcast %3 : vector<1x16xf32> to vector<400x16xf32>
    %5 = arith.addf %2, %4 : vector<400x16xf32>
    %cst_5 = arith.constant 0.000000e+00 : f32
    %6 = vector.broadcast %cst_5 : f32 to vector<400x16xf32>
    %7 = arith.maximumf %5, %6 : vector<400x16xf32>
    %8 = arith.truncf %7 : vector<400x16xf32> to vector<400x16xbf16>
    %c0_6 = arith.constant 0 : index
    %c0_7 = arith.constant 0 : index
    %9 = vector.load %arg4[%c0_6, %c0_7] : memref<400x16xbf16, #tpu.memory_space<vmem>>, vector<400x16xbf16>
    tpu.vector_store %arg4[%c0_6, %c0_7], %8 {strides = array<i32>} : memref<400x16xbf16, #tpu.memory_space<vmem>>, vector<400x16xbf16>,
    return
  }
  func.func @transform_0(%arg0: i32) -> (i32, i32) {
    %c0_i32 = arith.constant 0 : i32
    %c0_i32_0 = arith.constant 0 : i32
    return %arg0, %c0_i32 : i32, i32
  }
  func.func @transform_1(%arg0: i32) -> (i32, i32) {
    %c0_i32 = arith.constant 0 : i32
    %c0_i32_0 = arith.constant 0 : i32
    %c0_i32_1 = arith.constant 0 : i32
    return %c0_i32, %c0_i32_0 : i32, i32
  }
  func.func @transform_2(%arg0: i32) -> (i32, i32) {
    %c0_i32 = arith.constant 0 : i32
    %c0_i32_0 = arith.constant 0 : i32
    %c0_i32_1 = arith.constant 0 : i32
    return %c0_i32, %c0_i32_0 : i32, i32
  }
  func.func @transform_3(%arg0: i32) -> (i32, i32) {
    %c0_i32 = arith.constant 0 : i32
    %c0_i32_0 = arith.constant 0 : i32
    return %arg0, %c0_i32 : i32, i32
  }
}

module attributes {stable_mosaic.version = 11 : i64} {
  func.func @_linear_kernel(%arg0: i32, %arg1: memref<88x256xbf16, #tpu.memory_space<vmem>>, %arg2: memref<256x32xbf16, #tpu.memory_space<vmem>>, %arg3: memref<1x32xf32, #tpu.memory_space<vmem>>, %arg4: memref<88x32xbf16, #tpu.memory_space<vmem>>) attributes {dimension_semantics = [#tpu.dimension_semantics<parallel>], iteration_bounds = array<i64: 2>, scalar_prefetch = 0 : i64, scratch_operands = 0 : i64, tpu.core_type = #tpu.core_type<tc>, window_params = [{transform_indices = @transform_0, window_bounds = array<i64: 88, 256>}, {pipeline_mode = #tpu.pipeline_mode<synchronous>, transform_indices = @transform_1, window_bounds = array<i64: 256, 32>}, {pipeline_mode = #tpu.pipeline_mode<synchronous>, transform_indices = @transform_2, window_bounds = array<i64: 1, 32>}, {transform_indices = @transform_3, window_bounds = array<i64: 88, 32>}]} {
    %c0 = arith.constant 0 : index
    %c0_0 = arith.constant 0 : index
    %0 = vector.load %arg1[%c0, %c0_0] : memref<88x256xbf16, #tpu.memory_space<vmem>>, vector<88x256xbf16>
    %c0_1 = arith.constant 0 : index
    %c0_2 = arith.constant 0 : index
    %1 = vector.load %arg2[%c0_1, %c0_2] : memref<256x32xbf16, #tpu.memory_space<vmem>>, vector<256x32xbf16>
    %cst = arith.constant dense<0.000000e+00> : vector<88x32xf32>
    %2 = tpu.matmul %0, %1, %cst {dimension_numbers = #tpu.dot_dimension_numbers<[1], [0], [0], [1], [0, 0, 1, 1], [], []>} : vector<88x256xbf16>, vector<256x32xbf16>, vector<88x32xf32> -> vector<88x32xf32>
    %c0_3 = arith.constant 0 : index
    %c0_4 = arith.constant 0 : index
    %3 = vector.load %arg3[%c0_3, %c0_4] : memref<1x32xf32, #tpu.memory_space<vmem>>, vector<1x32xf32>
    %4 = vector.broadcast %3 : vector<1x32xf32> to vector<88x32xf32>
    %5 = arith.addf %2, %4 : vector<88x32xf32>
    %cst_5 = arith.constant 0.000000e+00 : f32
    %6 = vector.broadcast %cst_5 : f32 to vector<88x32xf32>
    %7 = arith.maximumf %5, %6 : vector<88x32xf32>
    %8 = arith.truncf %7 : vector<88x32xf32> to vector<88x32xbf16>
    %c0_6 = arith.constant 0 : index
    %c0_7 = arith.constant 0 : index
    %9 = vector.load %arg4[%c0_6, %c0_7] : memref<88x32xbf16, #tpu.memory_space<vmem>>, vector<88x32xbf16>
    tpu.vector_store %arg4[%c0_6, %c0_7], %8 {strides = array<i32>} : memref<88x32xbf16, #tpu.memory_space<vmem>>, vector<88x32xbf16>,
    return
  }
  func.func @transform_0(%arg0: i32) -> (i32, i32) {
    %c0_i32 = arith.constant 0 : i32
    %c0_i32_0 = arith.constant 0 : i32
    return %arg0, %c0_i32 : i32, i32
  }
  func.func @transform_1(%arg0: i32) -> (i32, i32) {
    %c0_i32 = arith.constant 0 : i32
    %c0_i32_0 = arith.constant 0 : i32
    %c0_i32_1 = arith.constant 0 : i32
    return %c0_i32, %c0_i32_0 : i32, i32
  }
  func.func @transform_2(%arg0: i32) -> (i32, i32) {
    %c0_i32 = arith.constant 0 : i32
    %c0_i32_0 = arith.constant 0 : i32
    %c0_i32_1 = arith.constant 0 : i32
    return %c0_i32, %c0_i32_0 : i32, i32
  }
  func.func @transform_3(%arg0: i32) -> (i32, i32) {
    %c0_i32 = arith.constant 0 : i32
    %c0_i32_0 = arith.constant 0 : i32
    return %arg0, %c0_i32 : i32, i32
  }
}

module attributes {stable_mosaic.version = 11 : i64} {
  func.func @_fc_fused_kernel(%arg0: i32, %arg1: memref<2x2592xbf16, #tpu.memory_space<vmem>>, %arg2: memref<2592x256xbf16, #tpu.memory_space<vmem>>, %arg3: memref<1x256xf32, #tpu.memory_space<vmem>>, %arg4: memref<256x6xbf16, #tpu.memory_space<vmem>>, %arg5: memref<1x6xf32, #tpu.memory_space<vmem>>, %arg6: memref<2x6xf32, #tpu.memory_space<vmem>>) attributes {dimension_semantics = [#tpu.dimension_semantics<parallel>], iteration_bounds = array<i64: 1>, scalar_prefetch = 0 : i64, scratch_operands = 0 : i64, tpu.core_type = #tpu.core_type<tc>, window_params = [{transform_indices = @transform_0, window_bounds = array<i64: 2, 2592>}, {pipeline_mode = #tpu.pipeline_mode<synchronous>, transform_indices = @transform_1, window_bounds = array<i64: 2592, 256>}, {pipeline_mode = #tpu.pipeline_mode<synchronous>, transform_indices = @transform_2, window_bounds = array<i64: 1, 256>}, {pipeline_mode = #tpu.pipeline_mode<synchronous>, transform_indices = @transform_3, window_bounds = array<i64: 256, 6>}, {pipeline_mode = #tpu.pipeline_mode<synchronous>, transform_indices = @transform_4, window_bounds = array<i64: 1, 6>}, {transform_indices = @transform_5, window_bounds = array<i64: 2, 6>}]} {
    %c0 = arith.constant 0 : index
    %c0_0 = arith.constant 0 : index
    %0 = vector.load %arg1[%c0, %c0_0] : memref<2x2592xbf16, #tpu.memory_space<vmem>>, vector<2x2592xbf16>
    %c0_1 = arith.constant 0 : index
    %c0_2 = arith.constant 0 : index
    %1 = vector.load %arg2[%c0_1, %c0_2] : memref<2592x256xbf16, #tpu.memory_space<vmem>>, vector<2592x256xbf16>
    %cst = arith.constant dense<0.000000e+00> : vector<2x256xf32>
    %2 = tpu.matmul %0, %1, %cst {dimension_numbers = #tpu.dot_dimension_numbers<[1], [0], [0], [1], [0, 0, 1, 1], [], []>} : vector<2x2592xbf16>, vector<2592x256xbf16>, vector<2x256xf32> -> vector<2x256xf32>
    %c0_3 = arith.constant 0 : index
    %c0_4 = arith.constant 0 : index
    %3 = vector.load %arg3[%c0_3, %c0_4] : memref<1x256xf32, #tpu.memory_space<vmem>>, vector<1x256xf32>
    %4 = vector.broadcast %3 : vector<1x256xf32> to vector<2x256xf32>
    %5 = arith.addf %2, %4 : vector<2x256xf32>
    %cst_5 = arith.constant 0.000000e+00 : f32
    %6 = vector.broadcast %cst_5 : f32 to vector<2x256xf32>
    %7 = arith.maximumf %5, %6 : vector<2x256xf32>
    %8 = arith.truncf %7 : vector<2x256xf32> to vector<2x256xbf16>
    %c0_6 = arith.constant 0 : index
    %c0_7 = arith.constant 0 : index
    %9 = vector.load %arg4[%c0_6, %c0_7] : memref<256x6xbf16, #tpu.memory_space<vmem>>, vector<256x6xbf16>
    %cst_8 = arith.constant dense<0.000000e+00> : vector<2x6xf32>
    %10 = tpu.matmul %8, %9, %cst_8 {dimension_numbers = #tpu.dot_dimension_numbers<[1], [0], [0], [1], [0, 0, 1, 1], [], []>} : vector<2x256xbf16>, vector<256x6xbf16>, vector<2x6xf32> -> vector<2x6xf32>
    %c0_9 = arith.constant 0 : index
    %c0_10 = arith.constant 0 : index
    %11 = vector.load %arg5[%c0_9, %c0_10] : memref<1x6xf32, #tpu.memory_space<vmem>>, vector<1x6xf32>
    %12 = vector.broadcast %11 : vector<1x6xf32> to vector<2x6xf32>
    %13 = arith.addf %10, %12 : vector<2x6xf32>
    %c0_11 = arith.constant 0 : index
    %c0_12 = arith.constant 0 : index
    %14 = vector.load %arg6[%c0_11, %c0_12] : memref<2x6xf32, #tpu.memory_space<vmem>>, vector<2x6xf32>
    tpu.vector_store %arg6[%c0_11, %c0_12], %13 {strides = array<i32>} : memref<2x6xf32, #tpu.memory_space<vmem>>, vector<2x6xf32>,
    return
  }
  func.func @transform_0(%arg0: i32) -> (i32, i32) {
    %c0_i32 = arith.constant 0 : i32
    %c0_i32_0 = arith.constant 0 : i32
    return %arg0, %c0_i32 : i32, i32
  }
  func.func @transform_1(%arg0: i32) -> (i32, i32) {
    %c0_i32 = arith.constant 0 : i32
    %c0_i32_0 = arith.constant 0 : i32
    %c0_i32_1 = arith.constant 0 : i32
    return %c0_i32, %c0_i32_0 : i32, i32
  }
  func.func @transform_2(%arg0: i32) -> (i32, i32) {
    %c0_i32 = arith.constant 0 : i32
    %c0_i32_0 = arith.constant 0 : i32
    %c0_i32_1 = arith.constant 0 : i32
    return %c0_i32, %c0_i32_0 : i32, i32
  }
  func.func @transform_3(%arg0: i32) -> (i32, i32) {
    %c0_i32 = arith.constant 0 : i32
    %c0_i32_0 = arith.constant 0 : i32
    %c0_i32_1 = arith.constant 0 : i32
    return %c0_i32, %c0_i32_0 : i32, i32
  }
  func.func @transform_4(%arg0: i32) -> (i32, i32) {
    %c0_i32 = arith.constant 0 : i32
    %c0_i32_0 = arith.constant 0 : i32
    %c0_i32_1 = arith.constant 0 : i32
    return %c0_i32, %c0_i32_0 : i32, i32
  }
  func.func @transform_5(%arg0: i32) -> (i32, i32) {
    %c0_i32 = arith.constant 0 : i32
    %c0_i32_0 = arith.constant 0 : i32
    return %arg0, %c0_i32 : i32, i32
  }
}

</mosaic_0001>

<bundles_post_ra>
// kernel: cnn_forward.3
= control target key start
LH: loop header
LB: loop body
LE: loop exit
PB: predicated region body
PF: predicated region fallthrough
CT: control target
= control target key end

     0   :  { %s1542_s12 = smov 0   ;;  %s1852_s0 = inlined_call_operand.vmem [shape: bf16[800,256], index: 0, kind: input, shape index: {}]   ;;  %s1853_s1 = inlined_call_operand.vmem [shape: bf16[256,16], index: 1, kind: input, shape index: {}]   ;;  %s1854_s2 = inlined_call_operand.vmem [shape: f32[1,16], index: 2, kind: input, shape index: {}]   ;;  %s1855_s3 = inlined_call_operand.vmem [shape: bf16[800,16], index: 3, kind: output, shape index: {}]  }
   0x1 LB: > { %s1203_s13 = sadd.s32 4294967295, %s1519_s12   ;;  %p1207_p0 = scmp.ge.s32.totalorder %s1519_s12, 1  ;;  %s1519_s12 = sphi %s1542_s12, %s13_s12  }
   0x2   : > { %p139_p1 = scmp.lt.s32.totalorder %s1519_s12, 3 }
   0x4   : > { %p140_p2 = pnand %p1207_p0, %p139_p1 }
   0x5   : > { %s164_s16 = smul.u32 (!%p140_p2), 50, %s1203_s13 }
   0x6   : > { %143 = sbr.rel (%p140_p2) target bundleno = 376 (0x178), region = 32 }
   0x7   : > { %p165_p3 = scmp.lt.s32.totalorder (!%p140_p2), %s164_s16, 99 }
   0xb   : > { %v1422_v0 = vld [vmem:[%s1853_s1 + $0x38] sm:$0xff]   ;;  %v1521_v1 = vmov 0   ;;  %v1423_v2 = vld [vmem:[%s1853_s1 + $0x30] sm:$0xff]   ;;  %v1424_v3 = vld [vmem:[%s1853_s1 + $0x28] sm:$0xff]   ;;  %s1857_s16 = smov (!%p165_p3, %s164_s16), 99  ;;  %vm1096_vm0 = vcmask 125952  }
   0xc   : > { %613 = vmatprep.subr.bf16.mxu0 %v1521_v1  ;;  %1381 = vmatprep.subr.bf16.mxu1 %v1521_v1  ;;  %v1425_v4 = vld [vmem:[%s1853_s1 + $0x20] sm:$0xff]   ;;  %s1330_s23 = sshll.u32 %s1857_s16, 3  ;;  %v1426_v5 = vld [vmem:[%s1853_s1 + $0x18] sm:$0xff]   ;;  %v1427_v7 = vld [vmem:[%s1853_s1 + $0x10] sm:$0xff]   ;;  %s1210_s29 = sshll.u32 %s1857_s16, 2 }
   0xd   : > { %614 = vmatpush1.bf16.msra.mxu0 %v1422_v0  ;;  %1397 = vmatpush1.bf16.msra.mxu1 %v1422_v0  ;;  %s1579_s28 = scalar_lea.vmem %s1852_s0, %s1330_s23  ;;  %v1428_v9 = vld [vmem:[%s1853_s1 + $0x8] sm:$0xff]   ;;  %v1429_v10 = vld [vmem:[%s1853_s1] sm:$0xff]   ;;  %v1430_v11 = vld [vmem:[%s1853_s1 + $0x78] sm:$0xff]  }
   0xe   : > { %615 = vmatprep.subr.bf16.mxu0 %v1521_v1  ;;  %1382 = vmatprep.subr.bf16.mxu1 %v1521_v1  ;;  %v1440_v6 = vld [vmem:[%s1579_s28 + $0x4] ss:$8 sps:$4 sm:$0xff]   ;;  %v1443_v8 = vld [vmem:[%s1579_s28 + $0xd4] ss:$8 sps:$4 sm:$0xff]   ;;  %v1438_v19 = vld [vmem:[%s1579_s28] ss:$8 sps:$4 sm:$0xff]  }
   0xf   : > { %645 = vmatprep.mubr.bf16.mxu0 %v1440_v6  ;;  %749 = vmatprep.mubr.bf16.mxu1 %v1443_v8  ;;  %v1431_v12 = vld [vmem:[%s1853_s1 + $0x70] sm:$0xff]   ;;  %v1432_v13 = vld [vmem:[%s1853_s1 + $0x68] sm:$0xff]   ;;  %v1433_v14 = vld [vmem:[%s1853_s1 + $0x60] sm:$0xff]  }
  0x10   : > { %v1434_v15 = vld [vmem:[%s1853_s1 + $0x58] sm:$0xff]   ;;  %v1435_v16 = vld [vmem:[%s1853_s1 + $0x50] sm:$0xff]   ;;  %v1436_v17 = vld [vmem:[%s1853_s1 + $0x48] sm:$0xff]  }
  0x11   : > { %616 = vmatpush1.bf16.msra.mxu0 %v1423_v2  ;;  %1398 = vmatpush1.bf16.msra.mxu1 %v1423_v2  ;;  %v1437_v18 = vld [vmem:[%s1853_s1 + $0x40] sm:$0xff]   ;;  %v1441_v20 = vld [vmem:[%s1579_s28 + $0xd0] ss:$8 sps:$4 sm:$0xff]   ;;  %v1444_v21 = vld [vmem:[%s1579_s28 + $0x14] ss:$8 sps:$4 sm:$0xff]  }
  0x12   : > { %617 = vmatprep.subr.bf16.mxu0 %v1521_v1  ;;  %1383 = vmatprep.subr.bf16.mxu1 %v1521_v1  ;;  %v1447_v22 = vld [vmem:[%s1579_s28 + $0xe4] ss:$8 sps:$4 sm:$0xff]   ;;  %v1446_v23 = vld [vmem:[%s1579_s28 + $0x10] ss:$8 sps:$4 sm:$0xff]   ;;  %v1449_v24 = vld [vmem:[%s1579_s28 + $0xe0] ss:$8 sps:$4 sm:$0xff]  }
  0x13   : > { %v1450_v25 = vld [vmem:[%s1579_s28 + $0x24] ss:$8 sps:$4 sm:$0xff]   ;;  %v1453_v26 = vld [vmem:[%s1579_s28 + $0xf4] ss:$8 sps:$4 sm:$0xff]   ;;  %v1452_v27 = vld [vmem:[%s1579_s28 + $0x20] ss:$8 sps:$4 sm:$0xff]  }
  0x14   : > { %v1455_v28 = vld [vmem:[%s1579_s28 + $0xf0] ss:$8 sps:$4 sm:$0xff]   ;;  %v1456_v29 = vld [vmem:[%s1579_s28 + $0x34] ss:$8 sps:$4 sm:$0xff]   ;;  %v1459_v30 = vld [vmem:[%s1579_s28 + $0x104] ss:$8 sps:$4 sm:$0xff]  }
  0x15   : > { %618 = vmatpush1.bf16.msra.mxu0 %v1424_v3  ;;  %1399 = vmatpush1.bf16.msra.mxu1 %v1424_v3  ;;  %v1458_v31 = vld [vmem:[%s1579_s28 + $0x30] ss:$8 sps:$4 sm:$0xff]   ;;  %v1461_v32 = vld [vmem:[%s1579_s28 + $0x100] ss:$8 sps:$4 sm:$0xff]   ;;  %v1462_v33 = vld [vmem:[%s1579_s28 + $0x44] ss:$8 sps:$4 sm:$0xff]  }
  0x16   : > { %619 = vmatprep.subr.bf16.mxu0 %v1521_v1  ;;  %1384 = vmatprep.subr.bf16.mxu1 %v1521_v1  ;;  %v1465_v34 = vld [vmem:[%s1579_s28 + $0x114] ss:$8 sps:$4 sm:$0xff]   ;;  %v1464_v35 = vld [vmem:[%s1579_s28 + $0x40] ss:$8 sps:$4 sm:$0xff]   ;;  %v1467_v36 = vld [vmem:[%s1579_s28 + $0x110] ss:$8 sps:$4 sm:$0xff]  }
  0x17   : > { %v1468_v37 = vld [vmem:[%s1579_s28 + $0x54] ss:$8 sps:$4 sm:$0xff]   ;;  %v1471_v38 = vld [vmem:[%s1579_s28 + $0x124] ss:$8 sps:$4 sm:$0xff]   ;;  %v1470_v39 = vld [vmem:[%s1579_s28 + $0x50] ss:$8 sps:$4 sm:$0xff]  }
  0x18   : > { %v1473_v40 = vld [vmem:[%s1579_s28 + $0x120] ss:$8 sps:$4 sm:$0xff]   ;;  %v1474_v41 = vld [vmem:[%s1579_s28 + $0x64] ss:$8 sps:$4 sm:$0xff]   ;;  %v1477_v42 = vld [vmem:[%s1579_s28 + $0x134] ss:$8 sps:$4 sm:$0xff]  }
  0x19   : > { %620 = vmatpush1.bf16.msra.mxu0 %v1425_v4  ;;  %1400 = vmatpush1.bf16.msra.mxu1 %v1425_v4  ;;  %v1476_v43 = vld [vmem:[%s1579_s28 + $0x60] ss:$8 sps:$4 sm:$0xff]   ;;  %v1479_v44 = vld [vmem:[%s1579_s28 + $0x130] ss:$8 sps:$4 sm:$0xff]   ;;  %v1480_v45 = vld [vmem:[%s1579_s28 + $0x74] ss:$8 sps:$4 sm:$0xff]  }
  0x1a   : > { %621 = vmatprep.subr.bf16.mxu0 %v1521_v1  ;;  %1385 = vmatprep.subr.bf16.mxu1 %v1521_v1  ;;  %v1483_v46 = vld [vmem:[%s1579_s28 + $0x144] ss:$8 sps:$4 sm:$0xff]   ;;  %v1482_v47 = vld [vmem:[%s1579_s28 + $0x70] ss:$8 sps:$4 sm:$0xff]   ;;  %v1485_v48 = vld [vmem:[%s1579_s28 + $0x140] ss:$8 sps:$4 sm:$0xff]  }
  0x1b   : > { %v1486_v49 = vld [vmem:[%s1579_s28 + $0x84] ss:$8 sps:$4 sm:$0xff]   ;;  %v1489_v50 = vld [vmem:[%s1579_s28 + $0x154] ss:$8 sps:$4 sm:$0xff]   ;;  %v1488_v51 = vld [vmem:[%s1579_s28 + $0x80] ss:$8 sps:$4 sm:$0xff]  }
  0x1c   : > { %v1491_v52 = vld [vmem:[%s1579_s28 + $0x150] ss:$8 sps:$4 sm:$0xff]   ;;  %v1492_v53 = vld [vmem:[%s1579_s28 + $0x94] ss:$8 sps:$4 sm:$0xff]   ;;  %v1495_v54 = vld [vmem:[%s1579_s28 + $0x164] ss:$8 sps:$4 sm:$0xff]  }
  0x1d   : > { %622 = vmatpush1.bf16.msra.mxu0 %v1426_v5  ;;  %1401 = vmatpush1.bf16.msra.mxu1 %v1426_v5  ;;  %v1494_v55 = vld [vmem:[%s1579_s28 + $0x90] ss:$8 sps:$4 sm:$0xff]   ;;  %v1497_v56 = vld [vmem:[%s1579_s28 + $0x160] ss:$8 sps:$4 sm:$0xff]   ;;  %v1498_v57 = vld [vmem:[%s1579_s28 + $0xa4] ss:$8 sps:$4 sm:$0xff]  }
  0x1e   : > { %623 = vmatprep.subr.bf16.mxu0 %v1521_v1  ;;  %1386 = vmatprep.subr.bf16.mxu1 %v1521_v1  ;;  %v1501_v58 = vld [vmem:[%s1579_s28 + $0x174] ss:$8 sps:$4 sm:$0xff]   ;;  %v1500_v59 = vld [vmem:[%s1579_s28 + $0xa0] ss:$8 sps:$4 sm:$0xff]   ;;  %v1503_v60 = vld [vmem:[%s1579_s28 + $0x170] ss:$8 sps:$4 sm:$0xff]  }
  0x1f   : > { %v1504_v61 = vld [vmem:[%s1579_s28 + $0xb4] ss:$8 sps:$4 sm:$0xff]   ;;  %v1507_v62 = vld [vmem:[%s1579_s28 + $0x184] ss:$8 sps:$4 sm:$0xff]   ;;  %v1506_v63 = vld [vmem:[%s1579_s28 + $0xb0] ss:$8 sps:$4 sm:$0xff]  }
  0x20   : > { %v1509_v0 = vld [vmem:[%s1579_s28 + $0x180] ss:$8 sps:$4 sm:$0xff]  }
  0x21   : > { %624 = vmatpush1.bf16.msra.mxu0 %v1427_v7  ;;  %1402 = vmatpush1.bf16.msra.mxu1 %v1427_v7  ;;  %v1512_v2 = vld [vmem:[%s1579_s28 + $0xc0] ss:$8 sps:$4 sm:$0xff]  }
  0x22   : > { %625 = vmatprep.subr.bf16.mxu0 %v1521_v1  ;;  %1387 = vmatprep.subr.bf16.mxu1 %v1521_v1  ;;  %v1691_v3 = vld [vmem:[%s1854_s2] ss:$0 sm:$0xff] }
  0x25   : > { %626 = vmatpush1.bf16.msra.mxu0 %v1428_v9  ;;  %1403 = vmatpush1.bf16.msra.mxu1 %v1428_v9 }
  0x26   : > { %627 = vmatprep.subr.bf16.mxu0 %v1521_v1  ;;  %1388 = vmatprep.subr.bf16.mxu1 %v1521_v1 }
  0x29   : > { %628 = vmatpush1.bf16.msra.mxu0 %v1429_v10  ;;  %1404 = vmatpush1.bf16.msra.mxu1 %v1429_v10 }
  0x2a   : > { %629 = vmatprep.subr.bf16.mxu0 %v1521_v1  ;;  %1389 = vmatprep.subr.bf16.mxu1 %v1521_v1 }
  0x2d   : > { %630 = vmatpush2.bf16.msra.mxu0 %v1430_v11  ;;  %1405 = vmatpush2.bf16.msra.mxu1 %v1430_v11 }
  0x2e   : > { %631 = vmatprep.subr.bf16.mxu0 %v1521_v1  ;;  %1390 = vmatprep.subr.bf16.mxu1 %v1521_v1 }
  0x31   : > { %632 = vmatpush2.bf16.msra.mxu0 %v1431_v12  ;;  %1406 = vmatpush2.bf16.msra.mxu1 %v1431_v12 }
  0x32   : > { %633 = vmatprep.subr.bf16.mxu0 %v1521_v1  ;;  %1391 = vmatprep.subr.bf16.mxu1 %v1521_v1 }
  0x35   : > { %634 = vmatpush2.bf16.msra.mxu0 %v1432_v13  ;;  %1407 = vmatpush2.bf16.msra.mxu1 %v1432_v13 }
  0x36   : > { %635 = vmatprep.subr.bf16.mxu0 %v1521_v1  ;;  %1392 = vmatprep.subr.bf16.mxu1 %v1521_v1 }
  0x39   : > { %636 = vmatpush2.bf16.msra.mxu0 %v1433_v14  ;;  %1408 = vmatpush2.bf16.msra.mxu1 %v1433_v14 }
  0x3a   : > { %637 = vmatprep.subr.bf16.mxu0 %v1521_v1  ;;  %1393 = vmatprep.subr.bf16.mxu1 %v1521_v1 }
  0x3d   : > { %638 = vmatpush2.bf16.msra.mxu0 %v1434_v15  ;;  %1409 = vmatpush2.bf16.msra.mxu1 %v1434_v15 }
  0x3e   : > { %639 = vmatprep.subr.bf16.mxu0 %v1521_v1  ;;  %1394 = vmatprep.subr.bf16.mxu1 %v1521_v1 }
  0x41   : > { %640 = vmatpush2.bf16.msra.mxu0 %v1435_v16  ;;  %1410 = vmatpush2.bf16.msra.mxu1 %v1435_v16 }
  0x42   : > { %641 = vmatprep.subr.bf16.mxu0 %v1521_v1  ;;  %1395 = vmatprep.subr.bf16.mxu1 %v1521_v1 }
  0x45   : > { %642 = vmatpush2.bf16.msra.mxu0 %v1436_v17  ;;  %1411 = vmatpush2.bf16.msra.mxu1 %v1436_v17 }
  0x46   : > { %643 = vmatprep.subr.bf16.mxu0 %v1521_v1  ;;  %1396 = vmatprep.subr.bf16.mxu1 %v1521_v1  ;;  %v1510_v1 = vld [vmem:[%s1579_s28 + $0xc4] ss:$8 sps:$4 sm:$0xff]   ;;  %s1699_s28 = scalar_lea.vmem %s1855_s3, %s1210_s29 }
  0x49   : > { %644 = vmatpush2.bf16.msra.mxu0 %v1437_v18  ;;  %1412 = vmatpush2.bf16.msra.mxu1 %v1437_v18 }
  0x4c   : > { %646 = vmatmul.mubr.bf16.vlgmr.msra.gmra.mxu0 %v1438_v19  ;;  %750 = vmatmul.mubr.bf16.vlgmr.msra.gmra.mxu1 %v1441_v20 }
  0x4d   : > { %653 = vmatprep.mubr.bf16.mxu0 %v1444_v21  ;;  %757 = vmatprep.mubr.bf16.mxu1 %v1447_v22 }
  0x54   : > { %654 = vmatmul.mubr.bf16.gmra.mxu0 %v1446_v23  ;;  %758 = vmatmul.mubr.bf16.gmra.mxu1 %v1449_v24 }
  0x55   : > { %661 = vmatprep.mubr.bf16.mxu0 %v1450_v25  ;;  %765 = vmatprep.mubr.bf16.mxu1 %v1453_v26 }
  0x5c   : > { %662 = vmatmul.mubr.bf16.gmra.mxu0 %v1452_v27  ;;  %766 = vmatmul.mubr.bf16.gmra.mxu1 %v1455_v28 }
  0x5d   : > { %669 = vmatprep.mubr.bf16.mxu0 %v1456_v29  ;;  %773 = vmatprep.mubr.bf16.mxu1 %v1459_v30 }
  0x64   : > { %670 = vmatmul.mubr.bf16.gmra.mxu0 %v1458_v31  ;;  %774 = vmatmul.mubr.bf16.gmra.mxu1 %v1461_v32 }
  0x65   : > { %677 = vmatprep.mubr.bf16.mxu0 %v1462_v33  ;;  %781 = vmatprep.mubr.bf16.mxu1 %v1465_v34 }
  0x6c   : > { %678 = vmatmul.mubr.bf16.gmra.mxu0 %v1464_v35  ;;  %782 = vmatmul.mubr.bf16.gmra.mxu1 %v1467_v36 }
  0x6d   : > { %685 = vmatprep.mubr.bf16.mxu0 %v1468_v37  ;;  %789 = vmatprep.mubr.bf16.mxu1 %v1471_v38 }
  0x74   : > { %686 = vmatmul.mubr.bf16.gmra.mxu0 %v1470_v39  ;;  %790 = vmatmul.mubr.bf16.gmra.mxu1 %v1473_v40 }
  0x75   : > { %693 = vmatprep.mubr.bf16.mxu0 %v1474_v41  ;;  %797 = vmatprep.mubr.bf16.mxu1 %v1477_v42 }
  0x7c   : > { %694 = vmatmul.mubr.bf16.gmra.mxu0 %v1476_v43  ;;  %798 = vmatmul.mubr.bf16.gmra.mxu1 %v1479_v44 }
  0x7d   : > { %701 = vmatprep.mubr.bf16.mxu0 %v1480_v45  ;;  %805 = vmatprep.mubr.bf16.mxu1 %v1483_v46 }
  0x84   : > { %702 = vmatmul.mubr.bf16.gmra.mxu0 %v1482_v47  ;;  %806 = vmatmul.mubr.bf16.gmra.mxu1 %v1485_v48 }
  0x85   : > { %709 = vmatprep.mubr.bf16.mxu0 %v1486_v49  ;;  %813 = vmatprep.mubr.bf16.mxu1 %v1489_v50 }
  0x8c   : > { %710 = vmatmul.mubr.bf16.gmra.mxu0 %v1488_v51  ;;  %814 = vmatmul.mubr.bf16.gmra.mxu1 %v1491_v52 }
  0x8d   : > { %717 = vmatprep.mubr.bf16.mxu0 %v1492_v53  ;;  %821 = vmatprep.mubr.bf16.mxu1 %v1495_v54 }
  0x94   : > { %718 = vmatmul.mubr.bf16.gmra.mxu0 %v1494_v55  ;;  %822 = vmatmul.mubr.bf16.gmra.mxu1 %v1497_v56 }
  0x95   : > { %725 = vmatprep.mubr.bf16.mxu0 %v1498_v57  ;;  %829 = vmatprep.mubr.bf16.mxu1 %v1501_v58 }
  0x9c   : > { %726 = vmatmul.mubr.bf16.gmra.mxu0 %v1500_v59  ;;  %830 = vmatmul.mubr.bf16.gmra.mxu1 %v1503_v60 }
  0x9d   : > { %733 = vmatprep.mubr.bf16.mxu0 %v1504_v61  ;;  %837 = vmatprep.mubr.bf16.mxu1 %v1507_v62 }
  0xa4   : > { %734 = vmatmul.mubr.bf16.gmra.mxu0 %v1506_v63  ;;  %838 = vmatmul.mubr.bf16.gmra.mxu1 %v1509_v0 }
  0xa5   : > { %741 = vmatprep.mubr.bf16.mxu0 %v1510_v1 }
  0xac   : > { %742 = vmatmul.mubr.bf16.gmra.mxu0 %v1512_v2 }
 0x10c   : > { %v647_v4 = vpop.f32.mrf.mxu0  ;;  %v751_v5 = vpop.f32.mrf.mxu1 }
 0x10d   : > { %v648_v6 = vadd.f32 %v1691_v3, %v647_v4  ;;  %v752_v7 = vadd.f32 %v1691_v3, %v751_v5 }
 0x10e   : > { %v649_v8 = vpop.f32.mrf.mxu0  ;;  %v753_v9 = vpop.f32.mrf.mxu1 }
 0x10f   : > { %v846_v10 = vmax.f32 %v648_v6, 0.0  ;;  %v872_v11 = vmax.f32 %v752_v7, 0.0 }
 0x110   : > { %v650_v12 = vpop.f32.mrf.mxu0  ;;  %v754_v13 = vpop.f32.mrf.mxu1 }
 0x111   : > { %v1331_v14 = vpack.c.bf16 %v846_v10, %v846_v10  ;;  %v1357_v15 = vpack.c.bf16 %v872_v11, %v872_v11  ;;  %v651_v16 = vadd.f32 %v1691_v3, %v650_v12  ;;  %v755_v17 = vadd.f32 %v1691_v3, %v754_v13 }
 0x112   : > { %v652_v18 = vpop.f32.mrf.mxu0  ;;  %v756_v19 = vpop.f32.mrf.mxu1 }
 0x113   : > { %1097 = vst.msk [vmem:[%s1699_s28] sm:$0xf] %vm1096_vm0, %v1331_v14  ;;  %1123 = vst.msk [vmem:[%s1699_s28 + $0x68] sm:$0xf] %vm1096_vm0, %v1357_v15  ;;  %v847_v20 = vmax.f32 %v651_v16, 0.0  ;;  %v873_v21 = vmax.f32 %v755_v17, 0.0 }
 0x114   : > { %v655_v22 = vpop.f32.mrf.mxu0  ;;  %v759_v23 = vpop.f32.mrf.mxu1 }
 0x115   : > { %v1332_v24 = vpack.c.bf16 %v847_v20, %v847_v20  ;;  %v1358_v25 = vpack.c.bf16 %v873_v21, %v873_v21  ;;  %v656_v26 = vadd.f32 %v1691_v3, %v655_v22  ;;  %v760_v27 = vadd.f32 %v1691_v3, %v759_v23 }
 0x116   : > { %v657_v28 = vpop.f32.mrf.mxu0  ;;  %v761_v29 = vpop.f32.mrf.mxu1 }
 0x117   : > { %1098 = vst.msk [vmem:[%s1699_s28 + $0x4] sm:$0xf] %vm1096_vm0, %v1332_v24  ;;  %1124 = vst.msk [vmem:[%s1699_s28 + $0x6c] sm:$0xf] %vm1096_vm0, %v1358_v25  ;;  %v848_v30 = vmax.f32 %v656_v26, 0.0  ;;  %v874_v31 = vmax.f32 %v760_v27, 0.0 }
 0x118   : > { %v658_v32 = vpop.f32.mrf.mxu0  ;;  %v762_v33 = vpop.f32.mrf.mxu1 }
 0x119   : > { %v1333_v34 = vpack.c.bf16 %v848_v30, %v848_v30  ;;  %v1359_v35 = vpack.c.bf16 %v874_v31, %v874_v31  ;;  %v659_v36 = vadd.f32 %v1691_v3, %v658_v32  ;;  %v763_v37 = vadd.f32 %v1691_v3, %v762_v33 }
 0x11a   : > { %v660_v38 = vpop.f32.mrf.mxu0  ;;  %v764_v39 = vpop.f32.mrf.mxu1 }
 0x11b   : > { %1099 = vst.msk [vmem:[%s1699_s28 + $0x8] sm:$0xf] %vm1096_vm0, %v1333_v34  ;;  %1125 = vst.msk [vmem:[%s1699_s28 + $0x70] sm:$0xf] %vm1096_vm0, %v1359_v35  ;;  %v849_v40 = vmax.f32 %v659_v36, 0.0  ;;  %v875_v41 = vmax.f32 %v763_v37, 0.0 }
 0x11c   : > { %v663_v42 = vpop.f32.mrf.mxu0  ;;  %v767_v43 = vpop.f32.mrf.mxu1 }
 0x11d   : > { %v1334_v44 = vpack.c.bf16 %v849_v40, %v849_v40  ;;  %v1360_v45 = vpack.c.bf16 %v875_v41, %v875_v41  ;;  %v664_v46 = vadd.f32 %v1691_v3, %v663_v42  ;;  %v768_v47 = vadd.f32 %v1691_v3, %v767_v43 }
 0x11e   : > { %v665_v48 = vpop.f32.mrf.mxu0  ;;  %v769_v49 = vpop.f32.mrf.mxu1 }
 0x11f   : > { %1100 = vst.msk [vmem:[%s1699_s28 + $0xc] sm:$0xf] %vm1096_vm0, %v1334_v44  ;;  %1126 = vst.msk [vmem:[%s1699_s28 + $0x74] sm:$0xf] %vm1096_vm0, %v1360_v45  ;;  %v850_v50 = vmax.f32 %v664_v46, 0.0  ;;  %v876_v51 = vmax.f32 %v768_v47, 0.0 }
 0x120   : > { %v666_v52 = vpop.f32.mrf.mxu0  ;;  %v770_v53 = vpop.f32.mrf.mxu1 }
 0x121   : > { %v1335_v54 = vpack.c.bf16 %v850_v50, %v850_v50  ;;  %v1361_v55 = vpack.c.bf16 %v876_v51, %v876_v51  ;;  %v667_v56 = vadd.f32 %v1691_v3, %v666_v52  ;;  %v771_v57 = vadd.f32 %v1691_v3, %v770_v53 }
 0x122   : > { %v668_v58 = vpop.f32.mrf.mxu0  ;;  %v772_v59 = vpop.f32.mrf.mxu1 }
 0x123   : > { %1101 = vst.msk [vmem:[%s1699_s28 + $0x10] sm:$0xf] %vm1096_vm0, %v1335_v54  ;;  %1127 = vst.msk [vmem:[%s1699_s28 + $0x78] sm:$0xf] %vm1096_vm0, %v1361_v55  ;;  %v851_v60 = vmax.f32 %v667_v56, 0.0  ;;  %v877_v61 = vmax.f32 %v771_v57, 0.0 }
 0x124   : > { %v671_v62 = vpop.f32.mrf.mxu0  ;;  %v775_v63 = vpop.f32.mrf.mxu1 }
 0x125   : > { %v1336_v0 = vpack.c.bf16 %v851_v60, %v851_v60  ;;  %v1362_v1 = vpack.c.bf16 %v877_v61, %v877_v61  ;;  %v672_v2 = vadd.f32 %v1691_v3, %v671_v62  ;;  %v776_v4 = vadd.f32 %v1691_v3, %v775_v63 }
 0x126   : > { %v673_v5 = vpop.f32.mrf.mxu0  ;;  %v777_v6 = vpop.f32.mrf.mxu1 }
 0x127   : > { %1102 = vst.msk [vmem:[%s1699_s28 + $0x14] sm:$0xf] %vm1096_vm0, %v1336_v0  ;;  %1128 = vst.msk [vmem:[%s1699_s28 + $0x7c] sm:$0xf] %vm1096_vm0, %v1362_v1  ;;  %v852_v7 = vmax.f32 %v672_v2, 0.0  ;;  %v878_v8 = vmax.f32 %v776_v4, 0.0 }
 0x128   : > { %v674_v9 = vpop.f32.mrf.mxu0  ;;  %v778_v10 = vpop.f32.mrf.mxu1 }
 0x129   : > { %v1337_v11 = vpack.c.bf16 %v852_v7, %v852_v7  ;;  %v1363_v12 = vpack.c.bf16 %v878_v8, %v878_v8  ;;  %v675_v13 = vadd.f32 %v1691_v3, %v674_v9  ;;  %v779_v14 = vadd.f32 %v1691_v3, %v778_v10 }
 0x12a   : > { %v676_v15 = vpop.f32.mrf.mxu0  ;;  %v780_v16 = vpop.f32.mrf.mxu1 }
 0x12b   : > { %1103 = vst.msk [vmem:[%s1699_s28 + $0x18] sm:$0xf] %vm1096_vm0, %v1337_v11  ;;  %1129 = vst.msk [vmem:[%s1699_s28 + $0x80] sm:$0xf] %vm1096_vm0, %v1363_v12  ;;  %v853_v17 = vmax.f32 %v675_v13, 0.0  ;;  %v879_v18 = vmax.f32 %v779_v14, 0.0 }
 0x12c   : > { %v679_v19 = vpop.f32.mrf.mxu0  ;;  %v783_v20 = vpop.f32.mrf.mxu1 }
 0x12d   : > { %v1338_v21 = vpack.c.bf16 %v853_v17, %v853_v17  ;;  %v1364_v22 = vpack.c.bf16 %v879_v18, %v879_v18  ;;  %v680_v23 = vadd.f32 %v1691_v3, %v679_v19  ;;  %v784_v24 = vadd.f32 %v1691_v3, %v783_v20 }
 0x12e   : > { %v681_v25 = vpop.f32.mrf.mxu0  ;;  %v785_v26 = vpop.f32.mrf.mxu1 }
 0x12f   : > { %1104 = vst.msk [vmem:[%s1699_s28 + $0x1c] sm:$0xf] %vm1096_vm0, %v1338_v21  ;;  %1130 = vst.msk [vmem:[%s1699_s28 + $0x84] sm:$0xf] %vm1096_vm0, %v1364_v22  ;;  %v854_v27 = vmax.f32 %v680_v23, 0.0  ;;  %v880_v28 = vmax.f32 %v784_v24, 0.0 }
 0x130   : > { %v682_v29 = vpop.f32.mrf.mxu0  ;;  %v786_v30 = vpop.f32.mrf.mxu1 }
 0x131   : > { %v1339_v31 = vpack.c.bf16 %v854_v27, %v854_v27  ;;  %v1365_v32 = vpack.c.bf16 %v880_v28, %v880_v28  ;;  %v683_v33 = vadd.f32 %v1691_v3, %v682_v29  ;;  %v787_v34 = vadd.f32 %v1691_v3, %v786_v30 }
 0x132   : > { %v684_v35 = vpop.f32.mrf.mxu0  ;;  %v788_v36 = vpop.f32.mrf.mxu1 }
 0x133   : > { %1105 = vst.msk [vmem:[%s1699_s28 + $0x20] sm:$0xf] %vm1096_vm0, %v1339_v31  ;;  %1131 = vst.msk [vmem:[%s1699_s28 + $0x88] sm:$0xf] %vm1096_vm0, %v1365_v32  ;;  %v855_v37 = vmax.f32 %v683_v33, 0.0  ;;  %v881_v38 = vmax.f32 %v787_v34, 0.0 }
 0x134   : > { %v687_v39 = vpop.f32.mrf.mxu0  ;;  %v791_v40 = vpop.f32.mrf.mxu1 }
 0x135   : > { %v1340_v41 = vpack.c.bf16 %v855_v37, %v855_v37  ;;  %v1366_v42 = vpack.c.bf16 %v881_v38, %v881_v38  ;;  %v688_v43 = vadd.f32 %v1691_v3, %v687_v39  ;;  %v792_v44 = vadd.f32 %v1691_v3, %v791_v40 }
 0x136   : > { %v689_v45 = vpop.f32.mrf.mxu0  ;;  %v793_v46 = vpop.f32.mrf.mxu1 }
 0x137   : > { %1106 = vst.msk [vmem:[%s1699_s28 + $0x24] sm:$0xf] %vm1096_vm0, %v1340_v41  ;;  %1132 = vst.msk [vmem:[%s1699_s28 + $0x8c] sm:$0xf] %vm1096_vm0, %v1366_v42  ;;  %v856_v47 = vmax.f32 %v688_v43, 0.0  ;;  %v882_v48 = vmax.f32 %v792_v44, 0.0 }
 0x138   : > { %v690_v49 = vpop.f32.mrf.mxu0  ;;  %v794_v50 = vpop.f32.mrf.mxu1 }
 0x139   : > { %v1341_v51 = vpack.c.bf16 %v856_v47, %v856_v47  ;;  %v1367_v52 = vpack.c.bf16 %v882_v48, %v882_v48  ;;  %v691_v53 = vadd.f32 %v1691_v3, %v690_v49  ;;  %v795_v54 = vadd.f32 %v1691_v3, %v794_v50 }
 0x13a   : > { %v692_v55 = vpop.f32.mrf.mxu0  ;;  %v796_v56 = vpop.f32.mrf.mxu1 }
 0x13b   : > { %1107 = vst.msk [vmem:[%s1699_s28 + $0x28] sm:$0xf] %vm1096_vm0, %v1341_v51  ;;  %1133 = vst.msk [vmem:[%s1699_s28 + $0x90] sm:$0xf] %vm1096_vm0, %v1367_v52  ;;  %v857_v57 = vmax.f32 %v691_v53, 0.0  ;;  %v883_v58 = vmax.f32 %v795_v54, 0.0 }
 0x13c   : > { %v695_v59 = vpop.f32.mrf.mxu0  ;;  %v799_v60 = vpop.f32.mrf.mxu1 }
 0x13d   : > { %v1342_v61 = vpack.c.bf16 %v857_v57, %v857_v57  ;;  %v1368_v62 = vpack.c.bf16 %v883_v58, %v883_v58  ;;  %v696_v63 = vadd.f32 %v1691_v3, %v695_v59  ;;  %v800_v0 = vadd.f32 %v1691_v3, %v799_v60 }
 0x13e   : > { %v697_v1 = vpop.f32.mrf.mxu0  ;;  %v801_v2 = vpop.f32.mrf.mxu1 }
 0x13f   : > { %1108 = vst.msk [vmem:[%s1699_s28 + $0x2c] sm:$0xf] %vm1096_vm0, %v1342_v61  ;;  %1134 = vst.msk [vmem:[%s1699_s28 + $0x94] sm:$0xf] %vm1096_vm0, %v1368_v62  ;;  %v858_v4 = vmax.f32 %v696_v63, 0.0  ;;  %v884_v5 = vmax.f32 %v800_v0, 0.0 }
 0x140   : > { %v698_v6 = vpop.f32.mrf.mxu0  ;;  %v802_v7 = vpop.f32.mrf.mxu1 }
 0x141   : > { %v1343_v8 = vpack.c.bf16 %v858_v4, %v858_v4  ;;  %v1369_v9 = vpack.c.bf16 %v884_v5, %v884_v5  ;;  %v699_v10 = vadd.f32 %v1691_v3, %v698_v6  ;;  %v803_v11 = vadd.f32 %v1691_v3, %v802_v7 }
 0x142   : > { %v700_v12 = vpop.f32.mrf.mxu0  ;;  %v804_v13 = vpop.f32.mrf.mxu1 }
 0x143   : > { %1109 = vst.msk [vmem:[%s1699_s28 + $0x30] sm:$0xf] %vm1096_vm0, %v1343_v8  ;;  %1135 = vst.msk [vmem:[%s1699_s28 + $0x98] sm:$0xf] %vm1096_vm0, %v1369_v9  ;;  %v859_v14 = vmax.f32 %v699_v10, 0.0  ;;  %v885_v15 = vmax.f32 %v803_v11, 0.0 }
 0x144   : > { %v703_v16 = vpop.f32.mrf.mxu0  ;;  %v807_v17 = vpop.f32.mrf.mxu1 }
 0x145   : > { %v1344_v18 = vpack.c.bf16 %v859_v14, %v859_v14  ;;  %v1370_v19 = vpack.c.bf16 %v885_v15, %v885_v15  ;;  %v704_v20 = vadd.f32 %v1691_v3, %v703_v16  ;;  %v808_v21 = vadd.f32 %v1691_v3, %v807_v17 }
 0x146   : > { %v705_v22 = vpop.f32.mrf.mxu0  ;;  %v809_v23 = vpop.f32.mrf.mxu1 }
 0x147   : > { %1110 = vst.msk [vmem:[%s1699_s28 + $0x34] sm:$0xf] %vm1096_vm0, %v1344_v18  ;;  %1136 = vst.msk [vmem:[%s1699_s28 + $0x9c] sm:$0xf] %vm1096_vm0, %v1370_v19  ;;  %v860_v24 = vmax.f32 %v704_v20, 0.0  ;;  %v886_v25 = vmax.f32 %v808_v21, 0.0 }
 0x148   : > { %v706_v26 = vpop.f32.mrf.mxu0  ;;  %v810_v27 = vpop.f32.mrf.mxu1 }
 0x149   : > { %v1345_v28 = vpack.c.bf16 %v860_v24, %v860_v24  ;;  %v1371_v29 = vpack.c.bf16 %v886_v25, %v886_v25  ;;  %v707_v30 = vadd.f32 %v1691_v3, %v706_v26  ;;  %v811_v31 = vadd.f32 %v1691_v3, %v810_v27 }
 0x14a   : > { %v708_v32 = vpop.f32.mrf.mxu0  ;;  %v812_v33 = vpop.f32.mrf.mxu1 }
 0x14b   : > { %1111 = vst.msk [vmem:[%s1699_s28 + $0x38] sm:$0xf] %vm1096_vm0, %v1345_v28  ;;  %1137 = vst.msk [vmem:[%s1699_s28 + $0xa0] sm:$0xf] %vm1096_vm0, %v1371_v29  ;;  %v861_v34 = vmax.f32 %v707_v30, 0.0  ;;  %v887_v35 = vmax.f32 %v811_v31, 0.0 }
 0x14c   : > { %v711_v36 = vpop.f32.mrf.mxu0  ;;  %v815_v37 = vpop.f32.mrf.mxu1 }
 0x14d   : > { %v1346_v38 = vpack.c.bf16 %v861_v34, %v861_v34  ;;  %v1372_v39 = vpack.c.bf16 %v887_v35, %v887_v35  ;;  %v712_v40 = vadd.f32 %v1691_v3, %v711_v36  ;;  %v816_v41 = vadd.f32 %v1691_v3, %v815_v37 }
 0x14e   : > { %v713_v42 = vpop.f32.mrf.mxu0  ;;  %v817_v43 = vpop.f32.mrf.mxu1 }
 0x14f   : > { %1112 = vst.msk [vmem:[%s1699_s28 + $0x3c] sm:$0xf] %vm1096_vm0, %v1346_v38  ;;  %1138 = vst.msk [vmem:[%s1699_s28 + $0xa4] sm:$0xf] %vm1096_vm0, %v1372_v39  ;;  %v862_v44 = vmax.f32 %v712_v40, 0.0  ;;  %v888_v45 = vmax.f32 %v816_v41, 0.0 }
 0x150   : > { %v714_v46 = vpop.f32.mrf.mxu0  ;;  %v818_v47 = vpop.f32.mrf.mxu1 }
 0x151   : > { %v1347_v48 = vpack.c.bf16 %v862_v44, %v862_v44  ;;  %v1373_v49 = vpack.c.bf16 %v888_v45, %v888_v45  ;;  %v715_v50 = vadd.f32 %v1691_v3, %v714_v46  ;;  %v819_v51 = vadd.f32 %v1691_v3, %v818_v47 }
 0x152   : > { %v716_v52 = vpop.f32.mrf.mxu0  ;;  %v820_v53 = vpop.f32.mrf.mxu1 }
 0x153   : > { %1113 = vst.msk [vmem:[%s1699_s28 + $0x40] sm:$0xf] %vm1096_vm0, %v1347_v48  ;;  %1139 = vst.msk [vmem:[%s1699_s28 + $0xa8] sm:$0xf] %vm1096_vm0, %v1373_v49  ;;  %v863_v54 = vmax.f32 %v715_v50, 0.0  ;;  %v889_v55 = vmax.f32 %v819_v51, 0.0 }
 0x154   : > { %v719_v56 = vpop.f32.mrf.mxu0  ;;  %v823_v57 = vpop.f32.mrf.mxu1 }
 0x155   : > { %v1348_v58 = vpack.c.bf16 %v863_v54, %v863_v54  ;;  %v1374_v59 = vpack.c.bf16 %v889_v55, %v889_v55  ;;  %v720_v60 = vadd.f32 %v1691_v3, %v719_v56  ;;  %v824_v61 = vadd.f32 %v1691_v3, %v823_v57 }
 0x156   : > { %v721_v62 = vpop.f32.mrf.mxu0  ;;  %v825_v63 = vpop.f32.mrf.mxu1 }
 0x157   : > { %1114 = vst.msk [vmem:[%s1699_s28 + $0x44] sm:$0xf] %vm1096_vm0, %v1348_v58  ;;  %1140 = vst.msk [vmem:[%s1699_s28 + $0xac] sm:$0xf] %vm1096_vm0, %v1374_v59  ;;  %v864_v0 = vmax.f32 %v720_v60, 0.0  ;;  %v890_v1 = vmax.f32 %v824_v61, 0.0 }
 0x158   : > { %v722_v2 = vpop.f32.mrf.mxu0  ;;  %v826_v4 = vpop.f32.mrf.mxu1 }
 0x159   : > { %v1349_v5 = vpack.c.bf16 %v864_v0, %v864_v0  ;;  %v1375_v6 = vpack.c.bf16 %v890_v1, %v890_v1  ;;  %v723_v7 = vadd.f32 %v1691_v3, %v722_v2  ;;  %v827_v8 = vadd.f32 %v1691_v3, %v826_v4 }
 0x15a   : > { %v724_v9 = vpop.f32.mrf.mxu0  ;;  %v828_v10 = vpop.f32.mrf.mxu1 }
 0x15b   : > { %1115 = vst.msk [vmem:[%s1699_s28 + $0x48] sm:$0xf] %vm1096_vm0, %v1349_v5  ;;  %1141 = vst.msk [vmem:[%s1699_s28 + $0xb0] sm:$0xf] %vm1096_vm0, %v1375_v6  ;;  %v865_v11 = vmax.f32 %v723_v7, 0.0  ;;  %v891_v12 = vmax.f32 %v827_v8, 0.0 }
 0x15c   : > { %v727_v13 = vpop.f32.mrf.mxu0  ;;  %v831_v14 = vpop.f32.mrf.mxu1 }
 0x15d   : > { %v1350_v15 = vpack.c.bf16 %v865_v11, %v865_v11  ;;  %v1376_v16 = vpack.c.bf16 %v891_v12, %v891_v12  ;;  %v728_v17 = vadd.f32 %v1691_v3, %v727_v13  ;;  %v832_v18 = vadd.f32 %v1691_v3, %v831_v14 }
 0x15e   : > { %v729_v19 = vpop.f32.mrf.mxu0  ;;  %v833_v20 = vpop.f32.mrf.mxu1 }
 0x15f   : > { %1116 = vst.msk [vmem:[%s1699_s28 + $0x4c] sm:$0xf] %vm1096_vm0, %v1350_v15  ;;  %1142 = vst.msk [vmem:[%s1699_s28 + $0xb4] sm:$0xf] %vm1096_vm0, %v1376_v16  ;;  %v866_v21 = vmax.f32 %v728_v17, 0.0  ;;  %v892_v22 = vmax.f32 %v832_v18, 0.0 }
 0x160   : > { %v730_v23 = vpop.f32.mrf.mxu0  ;;  %v834_v24 = vpop.f32.mrf.mxu1 }
 0x161   : > { %v1351_v25 = vpack.c.bf16 %v866_v21, %v866_v21  ;;  %v1377_v26 = vpack.c.bf16 %v892_v22, %v892_v22  ;;  %v731_v27 = vadd.f32 %v1691_v3, %v730_v23  ;;  %v835_v28 = vadd.f32 %v1691_v3, %v834_v24 }
 0x162   : > { %v732_v29 = vpop.f32.mrf.mxu0  ;;  %v836_v30 = vpop.f32.mrf.mxu1 }
 0x163   : > { %1117 = vst.msk [vmem:[%s1699_s28 + $0x50] sm:$0xf] %vm1096_vm0, %v1351_v25  ;;  %1143 = vst.msk [vmem:[%s1699_s28 + $0xb8] sm:$0xf] %vm1096_vm0, %v1377_v26  ;;  %v867_v31 = vmax.f32 %v731_v27, 0.0  ;;  %v893_v32 = vmax.f32 %v835_v28, 0.0 }
 0x164   : > { %v735_v33 = vpop.f32.mrf.mxu0  ;;  %v839_v34 = vpop.f32.mrf.mxu1 }
 0x165   : > { %v1352_v35 = vpack.c.bf16 %v867_v31, %v867_v31  ;;  %v1378_v36 = vpack.c.bf16 %v893_v32, %v893_v32  ;;  %v736_v37 = vadd.f32 %v1691_v3, %v735_v33  ;;  %v840_v38 = vadd.f32 %v1691_v3, %v839_v34 }
 0x166   : > { %v737_v39 = vpop.f32.mrf.mxu0  ;;  %v841_v40 = vpop.f32.mrf.mxu1 }
 0x167   : > { %1118 = vst.msk [vmem:[%s1699_s28 + $0x54] sm:$0xf] %vm1096_vm0, %v1352_v35  ;;  %1144 = vst.msk [vmem:[%s1699_s28 + $0xbc] sm:$0xf] %vm1096_vm0, %v1378_v36  ;;  %v868_v41 = vmax.f32 %v736_v37, 0.0  ;;  %v894_v42 = vmax.f32 %v840_v38, 0.0 }
 0x168   : > { %v738_v43 = vpop.f32.mrf.mxu0  ;;  %v842_v44 = vpop.f32.mrf.mxu1 }
 0x169   : > { %v1353_v45 = vpack.c.bf16 %v868_v41, %v868_v41  ;;  %v1379_v46 = vpack.c.bf16 %v894_v42, %v894_v42  ;;  %v739_v47 = vadd.f32 %v1691_v3, %v738_v43  ;;  %v843_v48 = vadd.f32 %v1691_v3, %v842_v44 }
 0x16a   : > { %v740_v49 = vpop.f32.mrf.mxu0  ;;  %v844_v50 = vpop.f32.mrf.mxu1 }
 0x16b   : > { %1119 = vst.msk [vmem:[%s1699_s28 + $0x58] sm:$0xf] %vm1096_vm0, %v1353_v45  ;;  %1145 = vst.msk [vmem:[%s1699_s28 + $0xc0] sm:$0xf] %vm1096_vm0, %v1379_v46  ;;  %v869_v51 = vmax.f32 %v739_v47, 0.0  ;;  %v895_v52 = vmax.f32 %v843_v48, 0.0 }
 0x16c   : > { %v743_v53 = vpop.f32.mrf.mxu0 }
 0x16d   : > { %v1354_v54 = vpack.c.bf16 %v869_v51, %v869_v51  ;;  %v1380_v55 = vpack.c.bf16 %v895_v52, %v895_v52  ;;  %v744_v56 = vadd.f32 %v1691_v3, %v743_v53 }
 0x16e   : > { %v745_v57 = vpop.f32.mrf.mxu0 }
 0x16f   : > { %1120 = vst.msk [vmem:[%s1699_s28 + $0x5c] sm:$0xf] %vm1096_vm0, %v1354_v54  ;;  %1146 = vst.msk [vmem:[%s1699_s28 + $0xc4] sm:$0xf] %vm1096_vm0, %v1380_v55  ;;  %v870_v58 = vmax.f32 %v744_v56, 0.0 }
 0x170   : > { %v746_v59 = vpop.f32.mrf.mxu0 }
 0x171   : > { %v1355_v60 = vpack.c.bf16 %v870_v58, %v870_v58  ;;  %v747_v61 = vadd.f32 %v1691_v3, %v746_v59 }
 0x172   : > { %v748_v62 = vpop.f32.mrf.mxu0 }
 0x173   : > { %1121 = vst.msk [vmem:[%s1699_s28 + $0x60] sm:$0xf] %vm1096_vm0, %v1355_v60  ;;  %v871_v63 = vmax.f32 %v747_v61, 0.0 }
 0x175   : > { %v1356_v0 = vpack.c.bf16 %v871_v63, %v871_v63 }
 0x177   : > { %1122 = vst.msk [vmem:[%s1699_s28 + $0x64] sm:$0xf] %vm1096_vm0, %v1356_v0 }
 0x178 PF: > { %s13_s12 = sadd.s32 1, %s1519_s12  }
 0x179   : > { %p10_p4 = scmp.ge.s32.totalorder %s13_s12, 4  }
 0x17b   :  { %12 = sbr.rel (!%p10_p4) target bundleno = 1 (0x1), region = 62 }

// kernel: cnn_forward.4
= control target key start
LH: loop header
LB: loop body
LE: loop exit
PB: predicated region body
PF: predicated region fallthrough
CT: control target
= control target key end

     0   :  { %s1184_s12 = smov 0   ;;  %s1186_s13 = smov 0   ;;  %s1382_s0 = inlined_call_operand.vmem [shape: bf16[162,256], index: 0, kind: input, shape index: {}]   ;;  %s1383_s1 = inlined_call_operand.vmem [shape: bf16[256,32], index: 1, kind: input, shape index: {}]   ;;  %s1384_s2 = inlined_call_operand.vmem [shape: f32[1,32], index: 2, kind: input, shape index: {}]   ;;  %s1385_s3 = inlined_call_operand.vmem [shape: bf16[162,32], index: 3, kind: output, shape index: {}]  }
   0x1   :  { %s1188_s14 = smov 0  }
   0x2 LB: > { %s1197_s15 = sadd.s32 4294967295, %s1130_s14   ;;  %s1199_s16 = sadd.s32 1, %s1130_s14   ;;  %s1130_s14 = sphi %s1188_s14, %s1392_s14   ;;  %s1126_s13 = sphi %s1186_s13, %s1391_s13   ;;  %s1122_s12 = sphi %s1184_s12, %s1390_s12  }
   0x3   : > { %s85_s17 = ssub.s32 %s1130_s14, %s1199_s16  ;;  %s88_s18 = sadd.s32 1, %s1126_s13 }
   0x4   : > { %p86_p0 = scmp.eq.s32.totalorder %s85_s17, 0  ;;  %p98_p1 = scmp.ne.s32.totalorder %s1126_s13, %s1122_s12 }
   0x5   : > { %p99_p2 = scmp.eq.s32.totalorder %s1197_s15, 1  ;;  %p813_p3 = scmp.ge.s32.totalorder %s1130_s14, 1 }
   0x6   : > { %s1207_s19 = scalar_select %p86_p0, %s1126_s13, %s88_s18  }
   0x7   : > { %p1209_p4 = por %p99_p2, %p98_p1  ;;  %p149_p5 = scmp.lt.s32.totalorder %s1130_s14, 3 }
   0x9   : > { %p150_p6 = pnand %p813_p3, %p149_p5 }
   0xa   : > { %s1217_s23 = smul.u32 (!%p150_p6), 11, %s1197_s15 }
   0xb   : > { %153 = sbr.rel (%p150_p6) target bundleno = 334 (0x14e), region = 32 }
   0xc   : > { %p184_p7 = scmp.lt.s32.totalorder (!%p150_p6), %s1217_s23, 20 }
  0x10   : > { %v1039_v0 = vld [vmem:[%s1383_s1 + $0x78] sm:$0xff]   ;;  %v1041_v2 = vld [vmem:[%s1383_s1 + $0x70] sm:$0xff]   ;;  %v1043_v4 = vld [vmem:[%s1383_s1 + $0x68] sm:$0xff]   ;;  %s185_s7 = scalar_select %p184_p7, %s1217_s23, 20  ;;  %vm540_vm0 = vcmask 257024  }
  0x11   : > { %v1040_v1 = vld [vmem:[%s1383_s1 + $0x38] sm:$0xff]   ;;  %881 = vmatprep.subr.bf16.mxu0 %v1039_v0  ;;  %933 = vmatprep.subr.bf16.mxu1 %v1039_v0  ;;  %v1042_v3 = vld [vmem:[%s1383_s1 + $0x30] sm:$0xff]   ;;  %v1044_v5 = vld [vmem:[%s1383_s1 + $0x28] sm:$0xff]   ;;  %s560_s22 = ssub.s32 (%p1209_p4), 21, %s1217_s23 }
  0x12   : > { %882 = vmatpush3.bf16.msra.mxu0 %v1040_v1  ;;  %941 = vmatpush3.bf16.msra.mxu1 %v1040_v1  ;;  %v1045_v6 = vld [vmem:[%s1383_s1 + $0x60] sm:$0xff]   ;;  %s868_s14 = sshll.u32 %s185_s7, 3  ;;  %v1047_v8 = vld [vmem:[%s1383_s1 + $0x58] sm:$0xff]   ;;  %v1049_v10 = vld [vmem:[%s1383_s1 + $0x50] sm:$0xff]   ;;  %p561_p8 = scmp.lt.s32.totalorder (%p1209_p4), %s560_s22, 11 }
  0x13   : > { %883 = vmatprep.subr.bf16.mxu0 %v1041_v2  ;;  %934 = vmatprep.subr.bf16.mxu1 %v1041_v2  ;;  %v1046_v7 = vld [vmem:[%s1383_s1 + $0x20] sm:$0xff]   ;;  %s1248_s24 = scalar_lea.vmem %s1382_s0, %s868_s14  ;;  %v1048_v9 = vld [vmem:[%s1383_s1 + $0x18] sm:$0xff]   ;;  %v1050_v13 = vld [vmem:[%s1383_s1 + $0x10] sm:$0xff]   ;;  %s175_s14 = sand.u32 1, %s1122_s12  }
  0x14   : > { %v1057_v11 = vld [vmem:[%s1248_s24 + $0x4] ss:$8 sps:$4 sm:$0xff]   ;;  %v1060_v12 = vld [vmem:[%s1248_s24 + $0x34] ss:$8 sps:$4 sm:$0xff]   ;;  %v1055_v18 = vld [vmem:[%s1248_s24] ss:$8 sps:$4 sm:$0xff]  }
  0x15   : > { %v1051_v14 = vld [vmem:[%s1383_s1 + $0x48] sm:$0xff]   ;;  %436 = vmatprep.mubr.bf16.mxu0 %v1057_v11  ;;  %460 = vmatprep.mubr.bf16.mxu1 %v1060_v12  ;;  %v1053_v16 = vld [vmem:[%s1383_s1 + $0x40] sm:$0xff]   ;;  %v1058_v19 = vld [vmem:[%s1248_s24 + $0x30] ss:$8 sps:$4 sm:$0xff]   ;;  %s949_s21 = smul.u32 44, %s175_s14 }
  0x16   : > { %884 = vmatpush3.bf16.msra.mxu0 %v1042_v3  ;;  %942 = vmatpush3.bf16.msra.mxu1 %v1042_v3  ;;  %v1052_v15 = vld [vmem:[%s1383_s1 + $0x8] sm:$0xff]   ;;  %v1054_v17 = vld [vmem:[%s1383_s1] sm:$0xff]   ;;  %v1061_v20 = vld [vmem:[%s1248_s24 + $0x14] ss:$8 sps:$4 sm:$0xff]  }
  0x17   : > { %885 = vmatprep.subr.bf16.mxu0 %v1043_v4  ;;  %935 = vmatprep.subr.bf16.mxu1 %v1043_v4  ;;  %v1063_v21 = vld [vmem:[%s1248_s24 + $0x44] ss:$8 sps:$4 sm:$0xff]   ;;  %v211_v22 = vld [vmem:[%s1248_s24 + $0x50] sm:$0xff]  ;;  %v1066_v24 = vld [vmem:[%s1248_s24 + $0x40] ss:$8 sps:$4 sm:$0xff]   ;;  %s1292_s12 = scalar_lea.vmem [#allocation2], %s949_s21  }
  0x18   : > { %v1065_v23 = vld [vmem:[%s1248_s24 + $0x10] ss:$8 sps:$4 sm:$0xff]   ;;  %v1067_v25 = vld [vmem:[%s1248_s24 + $0x24] ss:$8 sps:$4 sm:$0xff]   ;;  %v828_v26 = vcombine.high %v211_v22, %v211_v22  ;;  %v1070_v27 = vld [vmem:[%s1248_s24 + $0x20] ss:$8 sps:$4 sm:$0xff]   ;;  %v827_v28 = vcombine.low %v211_v22, %v211_v22 }
  0x19   : > { %v1286_v31 = vld [vmem:[%s1384_s2] ss:$0 sm:$0xff]  ;;  %s880_s24 = smul.u32 (%p1209_p4), 44, %s1197_s15 }
  0x1a   : > { %886 = vmatpush3.bf16.msra.mxu0 %v1044_v5  ;;  %943 = vmatpush3.bf16.msra.mxu1 %v1044_v5 }
  0x1b   : > { %887 = vmatprep.subr.bf16.mxu0 %v1045_v6  ;;  %936 = vmatprep.subr.bf16.mxu1 %v1045_v6  ;;  %s1330_s27 = scalar_lea.vmem (%p1209_p4), %s1385_s3, %s880_s24  }
  0x1e   : > { %888 = vmatpush3.bf16.msra.mxu0 %v1046_v7  ;;  %944 = vmatpush3.bf16.msra.mxu1 %v1046_v7 }
  0x1f   : > { %889 = vmatprep.subr.bf16.mxu0 %v1047_v8  ;;  %937 = vmatprep.subr.bf16.mxu1 %v1047_v8 }
  0x22   : > { %890 = vmatpush3.bf16.msra.mxu0 %v1048_v9  ;;  %945 = vmatpush3.bf16.msra.mxu1 %v1048_v9 }
  0x23   : > { %891 = vmatprep.subr.bf16.mxu0 %v1049_v10  ;;  %938 = vmatprep.subr.bf16.mxu1 %v1049_v10 }
  0x26   : > { %892 = vmatpush3.bf16.msra.mxu0 %v1050_v13  ;;  %946 = vmatpush3.bf16.msra.mxu1 %v1050_v13 }
  0x27   : > { %893 = vmatprep.subr.bf16.mxu0 %v1051_v14  ;;  %939 = vmatprep.subr.bf16.mxu1 %v1051_v14 }
  0x2a   : > { %894 = vmatpush3.bf16.msra.mxu0 %v1052_v15  ;;  %947 = vmatpush3.bf16.msra.mxu1 %v1052_v15 }
  0x2b   : > { %895 = vmatprep.subr.bf16.mxu0 %v1053_v16  ;;  %940 = vmatprep.subr.bf16.mxu1 %v1053_v16 }
  0x2e   : > { %896 = vmatpush3.bf16.msra.mxu0 %v1054_v17  ;;  %948 = vmatpush3.bf16.msra.mxu1 %v1054_v17 }
  0x31   : > { %437 = vmatmul.mubr.bf16.vlgmr.msra.gmra.mxu0 %v1055_v18  ;;  %461 = vmatmul.mubr.bf16.vlgmr.msra.gmra.mxu1 %v1058_v19 }
  0x32   : > { %444 = vmatprep.mubr.bf16.mxu0 %v1061_v20  ;;  %468 = vmatprep.mubr.bf16.mxu1 %v1063_v21 }
  0x39   : > { %445 = vmatmul.mubr.bf16.gmra.mxu0 %v1065_v23  ;;  %469 = vmatmul.mubr.bf16.gmra.mxu1 %v1066_v24 }
  0x3a   : > { %452 = vmatprep.mubr.bf16.mxu0 %v1067_v25  ;;  %476 = vmatprep.mubr.bf16.mxu1 %v828_v26 }
  0x41   : > { %453 = vmatmul.mubr.bf16.gmra.mxu0 %v1070_v27  ;;  %477 = vmatmul.mubr.bf16.gmra.mxu1 %v827_v28 }
  0xf1   : > { %v897_v29 = vpop.f32.mrf.mxu0  ;;  %v915_v30 = vpop.f32.mrf.mxu1 }
  0xf3   : > { %v898_v32 = vpop.f32.mrf.mxu0  ;;  %v916_v33 = vpop.f32.mrf.mxu1 }
  0xf4   : > { %v899_v34 = vadd.f32 %v898_v32, %v897_v29  ;;  %v917_v35 = vadd.f32 %v916_v33, %v915_v30 }
  0xf5   : > { %v900_v36 = vpop.f32.mrf.mxu0  ;;  %v918_v37 = vpop.f32.mrf.mxu1 }
  0xf6   : > { %v439_v38 = vadd.f32 %v899_v34, %v1286_v31  ;;  %v463_v39 = vadd.f32 %v917_v35, %v1286_v31 }
  0xf7   : > { %v901_v40 = vpop.f32.mrf.mxu0  ;;  %v919_v41 = vpop.f32.mrf.mxu1 }
  0xf8   : > { %v484_v42 = vmax.f32 %v439_v38, 0.0  ;;  %v490_v43 = vmax.f32 %v463_v39, 0.0  ;;  %v902_v44 = vadd.f32 %v901_v40, %v900_v36  ;;  %v920_v45 = vadd.f32 %v919_v41, %v918_v37 }
  0xf9   : > { %v903_v46 = vpop.f32.mrf.mxu0  ;;  %v921_v47 = vpop.f32.mrf.mxu1 }
  0xfa   : > { %v869_v48 = vpack.c.bf16 %v484_v42, %v484_v42  ;;  %v875_v49 = vpack.c.bf16 %v490_v43, %v490_v43  ;;  %v442_v50 = vadd.f32 %v902_v44, %v1286_v31  ;;  %v466_v51 = vadd.f32 %v920_v45, %v1286_v31 }
  0xfb   : > { %v904_v52 = vpop.f32.mrf.mxu0  ;;  %v922_v53 = vpop.f32.mrf.mxu1 }
  0xfc   : > { %541 = vst.msk [vmem:[%s1292_s12] sm:$0xf] %vm540_vm0, %v869_v48  ;;  %547 = vst.msk [vmem:[%s1292_s12 + $0x18] sm:$0xf] %vm540_vm0, %v875_v49  ;;  %v485_v54 = vmax.f32 %v442_v50, 0.0  ;;  %v491_v55 = vmax.f32 %v466_v51, 0.0  ;;  %v905_v56 = vadd.f32 %v904_v52, %v903_v46  ;;  %v923_v57 = vadd.f32 %v922_v53, %v921_v47 }
  0xfd   : > { %v906_v58 = vpop.f32.mrf.mxu0  ;;  %v924_v59 = vpop.f32.mrf.mxu1 }
  0xfe   : > { %v870_v60 = vpack.c.bf16 %v485_v54, %v485_v54  ;;  %v876_v61 = vpack.c.bf16 %v491_v55, %v491_v55  ;;  %v447_v62 = vadd.f32 %v905_v56, %v1286_v31  ;;  %v471_v63 = vadd.f32 %v923_v57, %v1286_v31 }
  0xff   : > { %v907_v0 = vpop.f32.mrf.mxu0  ;;  %v925_v1 = vpop.f32.mrf.mxu1 }
 0x100   : > { %542 = vst.msk [vmem:[%s1292_s12 + $0x4] sm:$0xf] %vm540_vm0, %v870_v60  ;;  %548 = vst.msk [vmem:[%s1292_s12 + $0x1c] sm:$0xf] %vm540_vm0, %v876_v61  ;;  %v486_v2 = vmax.f32 %v447_v62, 0.0  ;;  %v492_v3 = vmax.f32 %v471_v63, 0.0  ;;  %v908_v4 = vadd.f32 %v907_v0, %v906_v58  ;;  %v926_v5 = vadd.f32 %v925_v1, %v924_v59 }
 0x101   : > { %v909_v6 = vpop.f32.mrf.mxu0  ;;  %v927_v7 = vpop.f32.mrf.mxu1 }
 0x102   : > { %v871_v8 = vpack.c.bf16 %v486_v2, %v486_v2  ;;  %v877_v9 = vpack.c.bf16 %v492_v3, %v492_v3  ;;  %v450_v10 = vadd.f32 %v908_v4, %v1286_v31  ;;  %v474_v11 = vadd.f32 %v926_v5, %v1286_v31 }
 0x103   : > { %v910_v12 = vpop.f32.mrf.mxu0  ;;  %v928_v13 = vpop.f32.mrf.mxu1 }
 0x104   : > { %543 = vst.msk [vmem:[%s1292_s12 + $0x8] sm:$0xf] %vm540_vm0, %v871_v8  ;;  %549 = vst.msk [vmem:[%s1292_s12 + $0x20] sm:$0xf] %vm540_vm0, %v877_v9  ;;  %v487_v14 = vmax.f32 %v450_v10, 0.0  ;;  %v493_v15 = vmax.f32 %v474_v11, 0.0  ;;  %v911_v16 = vadd.f32 %v910_v12, %v909_v6  ;;  %v929_v17 = vadd.f32 %v928_v13, %v927_v7 }
 0x105   : > { %v912_v18 = vpop.f32.mrf.mxu0  ;;  %v930_v19 = vpop.f32.mrf.mxu1 }
 0x106   : > { %v872_v20 = vpack.c.bf16 %v487_v14, %v487_v14  ;;  %v878_v21 = vpack.c.bf16 %v493_v15, %v493_v15  ;;  %v455_v22 = vadd.f32 %v911_v16, %v1286_v31  ;;  %v479_v23 = vadd.f32 %v929_v17, %v1286_v31 }
 0x107   : > { %v913_v24 = vpop.f32.mrf.mxu0  ;;  %v931_v25 = vpop.f32.mrf.mxu1 }
 0x108   : > { %544 = vst.msk [vmem:[%s1292_s12 + $0xc] sm:$0xf] %vm540_vm0, %v872_v20  ;;  %550 = vst.msk [vmem:[%s1292_s12 + $0x24] sm:$0xf] %vm540_vm0, %v878_v21  ;;  %v488_v26 = vmax.f32 %v455_v22, 0.0  ;;  %v494_v27 = vmax.f32 %v479_v23, 0.0  ;;  %v914_v28 = vadd.f32 %v913_v24, %v912_v18 }
 0x10a   : > { %v873_v29 = vpack.c.bf16 %v488_v26, %v488_v26  ;;  %v879_v30 = vpack.c.bf16 %v494_v27, %v494_v27  ;;  %v458_v32 = vadd.f32 %v914_v28, %v1286_v31 }
 0x10c   : > { %545 = vst.msk [vmem:[%s1292_s12 + $0x10] sm:$0xf] %vm540_vm0, %v873_v29  ;;  %551 = vst.msk [vmem:[%s1292_s12 + $0x28] sm:$0xf] %vm540_vm0, %v879_v30  ;;  %v489_v33 = vmax.f32 %v458_v32, 0.0  ;;  %558 = sbr.rel (!%p1209_p4) target bundleno = 334 (0x14e), region = 36 }
 0x10e   : > { %v874_v34 = vpack.c.bf16 %v489_v33, %v489_v33 }
 0x110   : > { %546 = vst.msk [vmem:[%s1292_s12 + $0x14] sm:$0xf] %vm540_vm0, %v874_v34 }
 0x111   : > { %s1394_s22 = smov (!%p561_p8, %s560_s22), 11 }
 0x112   : > { %s856_s28 = sshll.u32 %s1394_s22, 6 }
 0x113   : > { %p859_p9 = scmp.eq.s32.totalorder %s856_s28, 0 }
 0x114   : > { %1072 = sdivrem.u32 (!%p859_p9), %s1394_s22, 11 }
 0x115   : > { %569 = sbr.rel (%p859_p9) target bundleno = 334 (0x14e), region = 40 }
 0x11d   : > { %s1336_s20 = spop.drf %1072 }
 0x11e   : > { %p860_p10 = scmp.le.s32.totalorder %s1336_s20, 0 }
 0x11f   : > { %s1387_s15 = smov (!%p860_p10), %s1330_s27  ;;  %s1388_s23 = smov (!%p860_p10), %s1292_s12 }
 0x120   : > { %766 = sbr.rel (%p860_p10) target bundleno = 309 (0x135), region = 112  ;;  %s1345_s29 = smov (!%p860_p10), 0  }
 0x121   : > { %s1347_s30 = smov (!%p860_p10), 0  }
 0x125 LB: >> { %v587_v31 = vld [vmem:[%s1138_s23] sm:$0xf]  ;;  %v589_v35 = vld [vmem:[%s1138_s23 + $0x4] sm:$0xf]  ;;  %v591_v36 = vld [vmem:[%s1138_s23 + $0x8] sm:$0xf]  ;;  %s1146_s30 = sphi %s1347_s30, %s581_s30   ;;  %s1142_s29 = sphi %s1345_s29, %s1389_s29   ;;  %s1138_s23 = sphi %s1388_s23, %s614_s23   ;;  %s1134_s15 = sphi %s1387_s15, %s615_s15  }
 0x126   : >> { %588 = vst [vmem:[%s1134_s15] sm:$0xf] %v587_v31  ;;  %590 = vst [vmem:[%s1134_s15 + $0x4] sm:$0xf] %v589_v35  ;;  %v593_v37 = vld [vmem:[%s1138_s23 + $0xc] sm:$0xf]  ;;  %s609_s4 = sadd.s32 1, %s1142_s29 }
 0x127   : >> { %592 = vst [vmem:[%s1134_s15 + $0x8] sm:$0xf] %v591_v36  ;;  %v595_v38 = vld [vmem:[%s1138_s23 + $0x10] sm:$0xf]  ;;  %v597_v39 = vld [vmem:[%s1138_s23 + $0x14] sm:$0xf]  ;;  %p610_p11 = scmp.ge.s32.totalorder %s609_s4, %s1336_s20 }
 0x128   : >> { %594 = vst [vmem:[%s1134_s15 + $0xc] sm:$0xf] %v593_v37  ;;  %596 = vst [vmem:[%s1134_s15 + $0x10] sm:$0xf] %v595_v38  ;;  %v599_v40 = vld [vmem:[%s1138_s23 + $0x18] sm:$0xf] }
 0x129   : >> { %598 = vst [vmem:[%s1134_s15 + $0x14] sm:$0xf] %v597_v39  ;;  %v601_v41 = vld [vmem:[%s1138_s23 + $0x1c] sm:$0xf]  ;;  %v603_v42 = vld [vmem:[%s1138_s23 + $0x20] sm:$0xf] }
 0x12a   : >> { %600 = vst [vmem:[%s1134_s15 + $0x18] sm:$0xf] %v599_v40  ;;  %602 = vst [vmem:[%s1134_s15 + $0x1c] sm:$0xf] %v601_v41  ;;  %v605_v43 = vld [vmem:[%s1138_s23 + $0x24] sm:$0xf] }
 0x12b   : >> { %604 = vst [vmem:[%s1134_s15 + $0x20] sm:$0xf] %v603_v42  ;;  %v607_v44 = vld [vmem:[%s1138_s23 + $0x28] sm:$0xf]  ;;  %606 = vst [vmem:[%s1134_s15 + $0x24] sm:$0xf] %v605_v43 }
 0x12c   : >> { %608 = vst [vmem:[%s1134_s15 + $0x28] sm:$0xf] %v607_v44  ;;  %s1396_s4 = smov (%p610_p11, %s609_s4), 0  ;;  %s581_s30 = sadd.s32 1, %s1146_s30  }
 0x12d   : >> { %s612_s5 = smul.u32 44, %s1396_s4  ;;  %p580_p12 = scmp.ge.s32.totalorder %s581_s30, %s1336_s20 }
 0x12e   : >> { %s1389_s29 = smov %s1396_s4 }
 0x12f   : >> { %s614_s23 = scalar_lea.vmem %s1292_s12, %s612_s5 [#allocation2]   ;;  %s615_s15 = scalar_lea.vmem %s1330_s27, %s612_s5  }
 0x130   : > { %583 = sbr.rel (!%p580_p12) target bundleno = 293 (0x125), region = 118 }
 0x135 PF: > { %1074 = sdivrem.u32 %s1394_s22, 11 }
 0x136   : > { %s861_s6 = smul.u32 44, %s1336_s20 }
 0x138   : > { %s620_s7 = scalar_lea.vmem %s1292_s12, %s861_s6 [#allocation2]   ;;  %s622_s8 = scalar_lea.vmem %s1330_s27, %s861_s6  }
 0x13e   : > { %s1075_s9 = spop.drf %1074 }
 0x13f   : > { %p863_p13 = scmp.le.s32.totalorder %s1075_s9, 0 }
 0x140   : > { %s1148_s10 = smov (!%p863_p13), %s622_s8   ;;  %s1152_s11 = smov (!%p863_p13), %s620_s7  }
 0x141   : > { %780 = sbr.rel (%p863_p13) target bundleno = 334 (0x14e), region = 123  ;;  %s1156_s14 = smov (!%p863_p13), 0  }
 0x142   : > { %s1160_s17 = smov (!%p863_p13), 0  }
 0x146 LB: >> { %v632_v45 = vld [vmem:[%s1154_s11] sm:$0xf]  ;;  %s634_s18 = sadd.s32 1, %s1158_s14  ;;  %s626_s17 = sadd.s32 1, %s1162_s17   ;;  %s1162_s17 = sphi %s1160_s17, %s626_s17   ;;  %s1158_s14 = sphi %s1156_s14, %s1157_s14   ;;  %s1154_s11 = sphi %s1152_s11, %s639_s11   ;;  %s1150_s10 = sphi %s1148_s10, %s640_s10  }
 0x147   : >> { %633 = vst [vmem:[%s1150_s10] sm:$0xf] %v632_v45  ;;  %p635_p0 = scmp.ge.s32.totalorder %s634_s18, %s1075_s9  ;;  %p625_p1 = scmp.ge.s32.totalorder %s626_s17, %s1075_s9 }
 0x149   : >> { %s1398_s18 = smov (%p635_p0, %s634_s18), 0  ;;  %628 = sbr.rel (!%p625_p1) target bundleno = 326 (0x146), region = 129 }
 0x14a   : >> { %s864_s21 = sshll.u32 %s1398_s18, 2  ;;  %s1157_s14 = smov %s1398_s18  }
 0x14b   : >> { %s639_s11 = scalar_lea.vmem %s620_s7, %s864_s21 [#allocation2]   ;;  %s640_s10 = scalar_lea.vmem %s622_s8, %s864_s21  }
 0x14e PF: > { %p10_p2 = scmp.ge.s32.totalorder %s1199_s16, 4   ;;  %s1390_s12 = smov %s1126_s13 }
 0x14f   : > { %s1391_s13 = smov %s1207_s19  ;;  %s1392_s14 = smov %s1199_s16 }
 0x150   :  { %12 = sbr.rel (!%p10_p2) target bundleno = 2 (0x2), region = 140 }

// kernel: cnn_forward.5
= control target key start
LH: loop header
LB: loop body
LE: loop exit
PB: predicated region body
PF: predicated region fallthrough
CT: control target
= control target key end

     0   :  { %v351_v35 = vlaneseq  ;;  %v3685_v36 = vmov 1966171168   ;;  %s4816_s0 = inlined_call_operand.vmem [shape: bf16[2,2592], index: 0, kind: input, shape index: {}]   ;;  %s4817_s1 = inlined_call_operand.vmem [shape: bf16[2592,256], index: 1, kind: input, shape index: {}]   ;;  %s4818_s2 = inlined_call_operand.vmem [shape: f32[1,256], index: 2, kind: input, shape index: {}]   ;;  %s4819_s3 = inlined_call_operand.vmem [shape: bf16[256,6], index: 3, kind: input, shape index: {}]   ;;  %s4820_s4 = inlined_call_operand.vmem [shape: f32[1,6], index: 4, kind: input, shape index: {}]   ;;  %s4821_s5 = inlined_call_operand.hbm [shape: f32[2,6], index: 5, kind: output, shape index: {}]  }
   0x1   :  { %v3158_v0 = vld [vmem:[%s4817_s1 + $0x74] ss:$8 sps:$4 sm:$0xff]   ;;  %v3160_v1 = vld [vmem:[%s4817_s1 + $0x70] ss:$8 sps:$4 sm:$0xff]   ;;  %v3164_v4 = vld [vmem:[%s4817_s1 + $0x64] ss:$8 sps:$4 sm:$0xff]   ;;  %v366_v37 = vunpack.c.l.s4 %v3685_v36 }
   0x2   :  { %2145 = vmatprep.subr.bf16.mxu0 %v3158_v0  ;;  %v3161_v2 = vld [vmem:[%s4817_s1 + $0x174] ss:$8 sps:$4 sm:$0xff]   ;;  %v3163_v3 = vld [vmem:[%s4817_s1 + $0x170] ss:$8 sps:$4 sm:$0xff]   ;;  %v3166_v5 = vld [vmem:[%s4817_s1 + $0x60] ss:$8 sps:$4 sm:$0xff]  }
   0x3   :  { %2146 = vmatpush1.bf16.msra.mxu0 %v3160_v1  ;;  %2186 = vmatprep.subr.bf16.mxu1 %v3161_v2  ;;  %v3167_v6 = vld [vmem:[%s4817_s1 + $0x164] ss:$8 sps:$4 sm:$0xff]   ;;  %v3169_v7 = vld [vmem:[%s4817_s1 + $0x160] ss:$8 sps:$4 sm:$0xff]   ;;  %v3170_v8 = vld [vmem:[%s4817_s1 + $0x54] ss:$8 sps:$4 sm:$0xff]   ;;  %v367_v43 = vunpack.c.0.s8 %v366_v37 }
   0x4   :  { %2187 = vmatpush1.bf16.msra.mxu1 %v3163_v3  ;;  %2147 = vmatprep.subr.bf16.mxu0 %v3164_v4  ;;  %v3172_v9 = vld [vmem:[%s4817_s1 + $0x50] ss:$8 sps:$4 sm:$0xff]   ;;  %v3173_v10 = vld [vmem:[%s4817_s1 + $0x154] ss:$8 sps:$4 sm:$0xff]   ;;  %v3176_v11 = vld [vmem:[%s4817_s1 + $0x44] ss:$8 sps:$4 sm:$0xff]  }
   0x5   :  { %2188 = vmatprep.subr.bf16.mxu1 %v3167_v6  ;;  %v3175_v12 = vld [vmem:[%s4817_s1 + $0x150] ss:$8 sps:$4 sm:$0xff]   ;;  %v3179_v13 = vld [vmem:[%s4817_s1 + $0x144] ss:$8 sps:$4 sm:$0xff]   ;;  %v3178_v14 = vld [vmem:[%s4817_s1 + $0x40] ss:$8 sps:$4 sm:$0xff]  }
   0x6   :  { %v3182_v15 = vld [vmem:[%s4817_s1 + $0x34] ss:$8 sps:$4 sm:$0xff]   ;;  %v3181_v16 = vld [vmem:[%s4817_s1 + $0x140] ss:$8 sps:$4 sm:$0xff]   ;;  %v3184_v18 = vld [vmem:[%s4817_s1 + $0x30] ss:$8 sps:$4 sm:$0xff]  }
   0x7   :  { %2148 = vmatpush1.bf16.msra.mxu0 %v3166_v5  ;;  %v3185_v17 = vld [vmem:[%s4817_s1 + $0x134] ss:$8 sps:$4 sm:$0xff]   ;;  %v3188_v19 = vld [vmem:[%s4817_s1 + $0x24] ss:$8 sps:$4 sm:$0xff]   ;;  %v3187_v20 = vld [vmem:[%s4817_s1 + $0x130] ss:$8 sps:$4 sm:$0xff]  }
   0x8   :  { %2149 = vmatprep.subr.bf16.mxu0 %v3170_v8  ;;  %2189 = vmatpush1.bf16.msra.mxu1 %v3169_v7  ;;  %v3191_v21 = vld [vmem:[%s4817_s1 + $0x124] ss:$8 sps:$4 sm:$0xff]   ;;  %v3190_v22 = vld [vmem:[%s4817_s1 + $0x20] ss:$8 sps:$4 sm:$0xff]   ;;  %v3194_v23 = vld [vmem:[%s4817_s1 + $0x14] ss:$8 sps:$4 sm:$0xff]  }
   0x9   :  { %2190 = vmatprep.subr.bf16.mxu1 %v3173_v10  ;;  %v3193_v24 = vld [vmem:[%s4817_s1 + $0x120] ss:$8 sps:$4 sm:$0xff]   ;;  %v3197_v25 = vld [vmem:[%s4817_s1 + $0x114] ss:$8 sps:$4 sm:$0xff]   ;;  %v3196_v26 = vld [vmem:[%s4817_s1 + $0x10] ss:$8 sps:$4 sm:$0xff]  }
   0xa   :  { %v3200_v27 = vld [vmem:[%s4817_s1 + $0x4] ss:$8 sps:$4 sm:$0xff]   ;;  %v3199_v28 = vld [vmem:[%s4817_s1 + $0x110] ss:$8 sps:$4 sm:$0xff]   ;;  %v3202_v30 = vld [vmem:[%s4817_s1] ss:$8 sps:$4 sm:$0xff]  }
   0xb   :  { %2150 = vmatpush1.bf16.msra.mxu0 %v3172_v9  ;;  %v3203_v29 = vld [vmem:[%s4817_s1 + $0x104] ss:$8 sps:$4 sm:$0xff]   ;;  %v3206_v31 = vld [vmem:[%s4817_s1 + $0xf4] ss:$8 sps:$4 sm:$0xff]   ;;  %v3205_v32 = vld [vmem:[%s4817_s1 + $0x100] ss:$8 sps:$4 sm:$0xff]  }
   0xc   :  { %2151 = vmatprep.subr.bf16.mxu0 %v3176_v11  ;;  %2191 = vmatpush1.bf16.msra.mxu1 %v3175_v12  ;;  %v3209_v33 = vld [vmem:[%s4817_s1 + $0x1f4] ss:$8 sps:$4 sm:$0xff]   ;;  %v3208_v34 = vld [vmem:[%s4817_s1 + $0xf0] ss:$8 sps:$4 sm:$0xff]   ;;  %v3212_v38 = vld [vmem:[%s4817_s1 + $0xe4] ss:$8 sps:$4 sm:$0xff]  }
   0xd   :  { %2192 = vmatprep.subr.bf16.mxu1 %v3179_v13  ;;  %v3211_v39 = vld [vmem:[%s4817_s1 + $0x1f0] ss:$8 sps:$4 sm:$0xff]   ;;  %v3215_v40 = vld [vmem:[%s4817_s1 + $0x1e4] ss:$8 sps:$4 sm:$0xff]   ;;  %v3214_v41 = vld [vmem:[%s4817_s1 + $0xe0] ss:$8 sps:$4 sm:$0xff]  }
   0xe   :  { %v3835_v42 = vshrl.u32 %v351_v35, 7  ;;  %v3218_v44 = vld [vmem:[%s4817_s1 + $0xd4] ss:$8 sps:$4 sm:$0xff]   ;;  %v3217_v45 = vld [vmem:[%s4817_s1 + $0x1e0] ss:$8 sps:$4 sm:$0xff]  }
   0xf   :  { %2152 = vmatpush1.bf16.msra.mxu0 %v3178_v14  ;;  %v3221_v46 = vld [vmem:[%s4817_s1 + $0x1d4] ss:$8 sps:$4 sm:$0xff]   ;;  %v3220_v47 = vld [vmem:[%s4817_s1 + $0xd0] ss:$8 sps:$4 sm:$0xff]   ;;  %v3224_v49 = vld [vmem:[%s4817_s1 + $0xc4] ss:$8 sps:$4 sm:$0xff]  }
  0x10   :  { %2153 = vmatprep.subr.bf16.mxu0 %v3182_v15  ;;  %2193 = vmatpush1.bf16.msra.mxu1 %v3181_v16  ;;  %v3850_v48 = vsub.s32 %v367_v43, %v3835_v42  ;;  %v3223_v50 = vld [vmem:[%s4817_s1 + $0x1d0] ss:$8 sps:$4 sm:$0xff]   ;;  %v3227_v51 = vld [vmem:[%s4817_s1 + $0x1c4] ss:$8 sps:$4 sm:$0xff]   ;;  %v3226_v53 = vld [vmem:[%s4817_s1 + $0xc0] ss:$8 sps:$4 sm:$0xff]  }
  0x11   :  { %2194 = vmatprep.subr.bf16.mxu1 %v3185_v17  ;;  %v22_v52 = vld [vmem:[%s4816_s0] sm:$0xff]  ;;  %v3230_v55 = vld [vmem:[%s4817_s1 + $0xb4] ss:$8 sps:$4 sm:$0xff]   ;;  %v3232_v59 = vld [vmem:[%s4817_s1 + $0xb0] ss:$8 sps:$4 sm:$0xff]  }
  0x12   :  { %v371_v54 = vrot.slane %v22_v52, %v3850_v48  ;;  %v3229_v56 = vld [vmem:[%s4817_s1 + $0x1c0] ss:$8 sps:$4 sm:$0xff]   ;;  %v3233_v58 = vld [vmem:[%s4817_s1 + $0x1b4] ss:$8 sps:$4 sm:$0xff]   ;;  %v3236_v61 = vld [vmem:[%s4817_s1 + $0xa4] ss:$8 sps:$4 sm:$0xff]   ;;  %v364_v63 = vcombine.high %v22_v52, %v22_v52 }
  0x13   :  { %2154 = vmatpush1.bf16.msra.mxu0 %v3184_v18  ;;  %v3235_v62 = vld [vmem:[%s4817_s1 + $0x1b0] ss:$8 sps:$4 sm:$0xff]   ;;  %v3239_v1 = vld [vmem:[%s4817_s1 + $0x1a4] ss:$8 sps:$4 sm:$0xff]   ;;  %v3238_v2 = vld [vmem:[%s4817_s1 + $0xa0] ss:$8 sps:$4 sm:$0xff]  }
  0x14   :  { %2155 = vmatprep.subr.bf16.mxu0 %v3188_v19  ;;  %2195 = vmatpush1.bf16.msra.mxu1 %v3187_v20  ;;  %v379_v57 = vcombine.high %v371_v54, %v371_v54  ;;  %v3242_v3 = vld [vmem:[%s4817_s1 + $0x94] ss:$8 sps:$4 sm:$0xff]   ;;  %v3241_v4 = vld [vmem:[%s4817_s1 + $0x1a0] ss:$8 sps:$4 sm:$0xff]   ;;  %v3900_v5 = vrot.slane %v364_v63, %v3850_v48  ;;  %v3244_v7 = vld [vmem:[%s4817_s1 + $0x90] ss:$8 sps:$4 sm:$0xff]   ;;  %v387_v13 = vrot.slane %v371_v54, %v3850_v48 }
  0x15   :  { %2196 = vmatprep.subr.bf16.mxu1 %v3191_v21  ;;  %v3245_v6 = vld [vmem:[%s4817_s1 + $0x194] ss:$8 sps:$4 sm:$0xff]   ;;  %v3248_v8 = vld [vmem:[%s4817_s1 + $0x84] ss:$8 sps:$4 sm:$0xff]   ;;  %v3247_v9 = vld [vmem:[%s4817_s1 + $0x190] ss:$8 sps:$4 sm:$0xff]  }
  0x16   :  { %v401_v60 = vrot.slane %v379_v57, %v3850_v48  ;;  %v380_v10 = vcombine.high %v3900_v5, %v3900_v5  ;;  %v3251_v11 = vld [vmem:[%s4817_s1 + $0x184] ss:$8 sps:$4 sm:$0xff]   ;;  %v3250_v12 = vld [vmem:[%s4817_s1 + $0x80] ss:$8 sps:$4 sm:$0xff]   ;;  %v3257_v14 = vld [vmem:[%s4817_s1 + $0x274] ss:$8 sps:$4 sm:$0xff]   ;;  %v409_v19 = vcombine.high %v387_v13, %v387_v13 }
  0x17   :  { %2156 = vmatpush1.bf16.msra.mxu0 %v3190_v22  ;;  %v3253_v15 = vld [vmem:[%s4817_s1 + $0x180] ss:$8 sps:$4 sm:$0xff]   ;;  %v3260_v17 = vld [vmem:[%s4817_s1 + $0x374] ss:$8 sps:$4 sm:$0xff]   ;;  %v3255_v18 = vld [vmem:[%s4817_s1 + $0x270] ss:$8 sps:$4 sm:$0xff]  }
  0x18   :  { %2157 = vmatprep.subr.bf16.mxu0 %v3194_v23  ;;  %2197 = vmatpush1.bf16.msra.mxu1 %v3193_v24  ;;  %v411_v0 = vcombine.high %v401_v60, %v401_v60  ;;  %v408_v16 = vrot.slane %v380_v10, %v3850_v48  ;;  %v3263_v20 = vld [vmem:[%s4817_s1 + $0x264] ss:$8 sps:$4 sm:$0xff]   ;;  %v3258_v21 = vld [vmem:[%s4817_s1 + $0x370] ss:$8 sps:$4 sm:$0xff]   ;;  %v3261_v24 = vld [vmem:[%s4817_s1 + $0x260] ss:$8 sps:$4 sm:$0xff]  }
  0x19   :  { %2198 = vmatprep.subr.bf16.mxu1 %v3197_v25  ;;  %2177 = vmatprep.mubr.bf16.mxu0 %v401_v60  ;;  %v3266_v23 = vld [vmem:[%s4817_s1 + $0x364] ss:$8 sps:$4 sm:$0xff]   ;;  %v3269_v25 = vld [vmem:[%s4817_s1 + $0x254] ss:$8 sps:$4 sm:$0xff]   ;;  %v3279_v36 = vld [vmem:[%s4817_s1 + $0x230] ss:$8 sps:$4 sm:$0xff]  }
  0x1a   :  { %2218 = vmatprep.mubr.bf16.mxu1 %v411_v0  ;;  %v412_v22 = vcombine.high %v408_v16, %v408_v16  ;;  %v3284_v35 = vld [vmem:[%s4817_s1 + $0x334] ss:$8 sps:$4 sm:$0xff]   ;;  %v3287_v37 = vld [vmem:[%s4817_s1 + $0x224] ss:$8 sps:$4 sm:$0xff]   ;;  %v3288_v43 = vld [vmem:[%s4817_s1 + $0x320] ss:$8 sps:$4 sm:$0xff]  }
  0x1b   :  { %2158 = vmatpush1.bf16.msra.mxu0 %v3196_v26  ;;  %v3264_v26 = vld [vmem:[%s4817_s1 + $0x360] ss:$8 sps:$4 sm:$0xff]   ;;  %v3303_v54 = vld [vmem:[%s4817_s1 + $0x2f0] ss:$8 sps:$4 sm:$0xff]   ;;  %v3314_v57 = vld [vmem:[%s4817_s1 + $0x3e4] ss:$8 sps:$4 sm:$0xff]  }
  0x1c   :  { %2159 = vmatprep.subr.bf16.mxu0 %v3200_v27  ;;  %2199 = vmatpush1.bf16.msra.mxu1 %v3199_v28  ;;  %v3272_v27 = vld [vmem:[%s4817_s1 + $0x354] ss:$8 sps:$4 sm:$0xff]   ;;  %v3267_v28 = vld [vmem:[%s4817_s1 + $0x250] ss:$8 sps:$4 sm:$0xff]   ;;  %v3300_v52 = vld [vmem:[%s4817_s1 + $0x300] ss:$8 sps:$4 sm:$0xff]  }
  0x1d   :  { %2200 = vmatprep.subr.bf16.mxu1 %v3203_v29  ;;  %v3275_v29 = vld [vmem:[%s4817_s1 + $0x244] ss:$8 sps:$4 sm:$0xff]   ;;  %v3312_v60 = vld [vmem:[%s4817_s1 + $0x3e0] ss:$8 sps:$4 sm:$0xff]   ;;  %v3318_v0 = vld [vmem:[%s4817_s1 + $0x3d0] ss:$8 sps:$4 sm:$0xff]  }
  0x1e   :  { %v3323_v63 = vld [vmem:[%s4817_s1 + $0x2c4] ss:$8 sps:$4 sm:$0xff]  }
  0x1f   :  { %2160 = vmatpush1.bf16.msra.mxu0 %v3202_v30  ;;  %v3270_v30 = vld [vmem:[%s4817_s1 + $0x350] ss:$8 sps:$4 sm:$0xff]   ;;  %v3338_v10 = vld [vmem:[%s4817_s1 + $0x3a4] ss:$8 sps:$4 sm:$0xff]  }
  0x20   :  { %2161 = vmatprep.subr.bf16.mxu0 %v3206_v31  ;;  %2201 = vmatpush1.bf16.msra.mxu1 %v3205_v32  ;;  %v3278_v31 = vld [vmem:[%s4817_s1 + $0x344] ss:$8 sps:$4 sm:$0xff]   ;;  %v3273_v32 = vld [vmem:[%s4817_s1 + $0x240] ss:$8 sps:$4 sm:$0xff]  }
  0x21   :  { %2202 = vmatprep.subr.bf16.mxu1 %v3209_v33  ;;  %v3281_v33 = vld [vmem:[%s4817_s1 + $0x234] ss:$8 sps:$4 sm:$0xff]  }
  0x23   :  { %2162 = vmatpush2.bf16.msra.mxu0 %v3208_v34  ;;  %v3276_v34 = vld [vmem:[%s4817_s1 + $0x340] ss:$8 sps:$4 sm:$0xff]  }
  0x24   :  { %2163 = vmatprep.subr.bf16.mxu0 %v3212_v38  ;;  %2203 = vmatpush2.bf16.msra.mxu1 %v3211_v39  ;;  %v3282_v38 = vld [vmem:[%s4817_s1 + $0x330] ss:$8 sps:$4 sm:$0xff]   ;;  %v3290_v39 = vld [vmem:[%s4817_s1 + $0x324] ss:$8 sps:$4 sm:$0xff]  }
  0x25   :  { %2204 = vmatprep.subr.bf16.mxu1 %v3215_v40  ;;  %v3285_v40 = vld [vmem:[%s4817_s1 + $0x220] ss:$8 sps:$4 sm:$0xff]  }
  0x27   :  { %2164 = vmatpush2.bf16.msra.mxu0 %v3214_v41  ;;  %v3293_v41 = vld [vmem:[%s4817_s1 + $0x214] ss:$8 sps:$4 sm:$0xff]  }
  0x28   :  { %2165 = vmatprep.subr.bf16.mxu0 %v3218_v44  ;;  %2205 = vmatpush2.bf16.msra.mxu1 %v3217_v45  ;;  %v3296_v44 = vld [vmem:[%s4817_s1 + $0x314] ss:$8 sps:$4 sm:$0xff]   ;;  %v3291_v45 = vld [vmem:[%s4817_s1 + $0x210] ss:$8 sps:$4 sm:$0xff]  }
  0x29   :  { %2206 = vmatprep.subr.bf16.mxu1 %v3221_v46  ;;  %v3299_v46 = vld [vmem:[%s4817_s1 + $0x204] ss:$8 sps:$4 sm:$0xff]  }
  0x2b   :  { %2166 = vmatpush2.bf16.msra.mxu0 %v3220_v47  ;;  %v3294_v47 = vld [vmem:[%s4817_s1 + $0x310] ss:$8 sps:$4 sm:$0xff]  }
  0x2c   :  { %2167 = vmatprep.subr.bf16.mxu0 %v3224_v49  ;;  %2207 = vmatpush2.bf16.msra.mxu1 %v3223_v50  ;;  %v3302_v49 = vld [vmem:[%s4817_s1 + $0x304] ss:$8 sps:$4 sm:$0xff]   ;;  %v3297_v50 = vld [vmem:[%s4817_s1 + $0x200] ss:$8 sps:$4 sm:$0xff]  }
  0x2d   :  { %2208 = vmatprep.subr.bf16.mxu1 %v3227_v51  ;;  %v3305_v51 = vld [vmem:[%s4817_s1 + $0x2f4] ss:$8 sps:$4 sm:$0xff]  }
  0x2f   :  { %2168 = vmatpush2.bf16.msra.mxu0 %v3226_v53  ;;  %v3308_v53 = vld [vmem:[%s4817_s1 + $0x3f4] ss:$8 sps:$4 sm:$0xff]  }
  0x30   :  { %2169 = vmatprep.subr.bf16.mxu0 %v3230_v55  ;;  %2209 = vmatpush2.bf16.msra.mxu1 %v3229_v56  ;;  %v3311_v55 = vld [vmem:[%s4817_s1 + $0x2e4] ss:$8 sps:$4 sm:$0xff]   ;;  %v3306_v56 = vld [vmem:[%s4817_s1 + $0x3f0] ss:$8 sps:$4 sm:$0xff]  }
  0x31   :  { %2210 = vmatprep.subr.bf16.mxu1 %v3233_v58  ;;  %v3309_v58 = vld [vmem:[%s4817_s1 + $0x2e0] ss:$8 sps:$4 sm:$0xff]  }
  0x33   :  { %2170 = vmatpush2.bf16.msra.mxu0 %v3232_v59  ;;  %v3317_v59 = vld [vmem:[%s4817_s1 + $0x2d4] ss:$8 sps:$4 sm:$0xff]  }
  0x34   :  { %2171 = vmatprep.subr.bf16.mxu0 %v3236_v61  ;;  %2211 = vmatpush2.bf16.msra.mxu1 %v3235_v62  ;;  %v3320_v61 = vld [vmem:[%s4817_s1 + $0x3d4] ss:$8 sps:$4 sm:$0xff]   ;;  %v3315_v62 = vld [vmem:[%s4817_s1 + $0x2d0] ss:$8 sps:$4 sm:$0xff]  }
  0x35   :  { %2212 = vmatprep.subr.bf16.mxu1 %v3239_v1  ;;  %v3326_v1 = vld [vmem:[%s4817_s1 + $0x3c4] ss:$8 sps:$4 sm:$0xff]  }
  0x37   :  { %2172 = vmatpush2.bf16.msra.mxu0 %v3238_v2  ;;  %v3321_v2 = vld [vmem:[%s4817_s1 + $0x2c0] ss:$8 sps:$4 sm:$0xff]  }
  0x38   :  { %2173 = vmatprep.subr.bf16.mxu0 %v3242_v3  ;;  %2213 = vmatpush2.bf16.msra.mxu1 %v3241_v4  ;;  %v3329_v3 = vld [vmem:[%s4817_s1 + $0x2b4] ss:$8 sps:$4 sm:$0xff]   ;;  %v3324_v4 = vld [vmem:[%s4817_s1 + $0x3c0] ss:$8 sps:$4 sm:$0xff]  }
  0x39   :  { %2214 = vmatprep.subr.bf16.mxu1 %v3245_v6  ;;  %v3332_v6 = vld [vmem:[%s4817_s1 + $0x3b4] ss:$8 sps:$4 sm:$0xff]  }
  0x3b   :  { %2174 = vmatpush2.bf16.msra.mxu0 %v3244_v7  ;;  %v3327_v7 = vld [vmem:[%s4817_s1 + $0x2b0] ss:$8 sps:$4 sm:$0xff]  }
  0x3c   :  { %2175 = vmatprep.subr.bf16.mxu0 %v3248_v8  ;;  %2215 = vmatpush2.bf16.msra.mxu1 %v3247_v9  ;;  %v3335_v8 = vld [vmem:[%s4817_s1 + $0x2a4] ss:$8 sps:$4 sm:$0xff]   ;;  %v3330_v9 = vld [vmem:[%s4817_s1 + $0x3b0] ss:$8 sps:$4 sm:$0xff]  }
  0x3d   :  { %2216 = vmatprep.subr.bf16.mxu1 %v3251_v11  ;;  %v3333_v11 = vld [vmem:[%s4817_s1 + $0x2a0] ss:$8 sps:$4 sm:$0xff]  }
  0x3f   :  { %2176 = vmatpush2.bf16.msra.mxu0 %v3250_v12  ;;  %v3341_v12 = vld [vmem:[%s4817_s1 + $0x294] ss:$8 sps:$4 sm:$0xff]  }
  0x40   :  { %2227 = vmatprep.subr.bf16.mxu0 %v3257_v14  ;;  %2217 = vmatpush2.bf16.msra.mxu1 %v3253_v15  ;;  %v3344_v14 = vld [vmem:[%s4817_s1 + $0x394] ss:$8 sps:$4 sm:$0xff]   ;;  %v3339_v15 = vld [vmem:[%s4817_s1 + $0x290] ss:$8 sps:$4 sm:$0xff]  }
  0x41   :  { %2268 = vmatprep.subr.bf16.mxu1 %v3260_v17  ;;  %v3342_v17 = vld [vmem:[%s4817_s1 + $0x390] ss:$8 sps:$4 sm:$0xff]  }
  0x42   :  { %2178 = vmatmul.mubr.bf16.vlgmr.msra.gmra.mxu0 %v387_v13  ;;  %v3336_v13 = vld [vmem:[%s4817_s1 + $0x3a0] ss:$8 sps:$4 sm:$0xff]  }
  0x43   :  { %2228 = vmatpush1.bf16.msra.mxu0 %v3255_v18  ;;  %2259 = vmatprep.mubr.bf16.mxu0 %v408_v16  ;;  %v3347_v16 = vld [vmem:[%s4817_s1 + $0x284] ss:$8 sps:$4 sm:$0xff]  }
  0x44   :  { %2219 = vmatmul.mubr.bf16.vlgmr.msra.gmra.mxu1 %v409_v19  ;;  %2229 = vmatprep.subr.bf16.mxu0 %v3263_v20  ;;  %v3350_v18 = vld [vmem:[%s4817_s1 + $0x384] ss:$8 sps:$4 sm:$0xff]   ;;  %v3345_v19 = vld [vmem:[%s4817_s1 + $0x280] ss:$8 sps:$4 sm:$0xff]   ;;  %v394_v20 = vrot.slane %v3900_v5, %v3850_v48 }
  0x45   :  { %2269 = vmatpush1.bf16.msra.mxu1 %v3258_v21  ;;  %2300 = vmatprep.mubr.bf16.mxu1 %v412_v22  ;;  %v3353_v21 = vld [vmem:[%s4817_s1 + $0x474] ss:$8 sps:$4 sm:$0xff]   ;;  %v3348_v22 = vld [vmem:[%s4817_s1 + $0x380] ss:$8 sps:$4 sm:$0xff]  }
  0x46   :  { %2270 = vmatprep.subr.bf16.mxu1 %v3266_v23  ;;  %v3356_v23 = vld [vmem:[%s4817_s1 + $0x574] ss:$8 sps:$4 sm:$0xff]   ;;  %v410_v5 = vcombine.high %v394_v20, %v394_v20 }
  0x47   :  { %2230 = vmatpush1.bf16.msra.mxu0 %v3261_v24  ;;  %v3351_v24 = vld [vmem:[%s4817_s1 + $0x470] ss:$8 sps:$4 sm:$0xff]  }
  0x48   :  { %2231 = vmatprep.subr.bf16.mxu0 %v3269_v25  ;;  %v3359_v25 = vld [vmem:[%s4817_s1 + $0x464] ss:$8 sps:$4 sm:$0xff]  }
  0x49   :  { %2271 = vmatpush1.bf16.msra.mxu1 %v3264_v26  ;;  %v4136_v26 = vld [vmem:[%s4816_s0 + $0x8] sm:$0xff] }
  0x4a   :  { %2272 = vmatprep.subr.bf16.mxu1 %v3272_v27  ;;  %v3354_v27 = vld [vmem:[%s4817_s1 + $0x570] ss:$8 sps:$4 sm:$0xff]  }
  0x4b   :  { %2232 = vmatpush1.bf16.msra.mxu0 %v3267_v28  ;;  %v4143_v28 = vrot.slane %v4136_v26, %v3850_v48 }
  0x4c   :  { %2233 = vmatprep.subr.bf16.mxu0 %v3275_v29  ;;  %v3362_v29 = vld [vmem:[%s4817_s1 + $0x564] ss:$8 sps:$4 sm:$0xff]  }
  0x4d   :  { %2273 = vmatpush1.bf16.msra.mxu1 %v3270_v30  ;;  %v3357_v30 = vld [vmem:[%s4817_s1 + $0x460] ss:$8 sps:$4 sm:$0xff]  }
  0x4e   :  { %2274 = vmatprep.subr.bf16.mxu1 %v3278_v31  ;;  %v428_v31 = vcombine.high %v4143_v28, %v4143_v28 }
  0x4f   :  { %2234 = vmatpush1.bf16.msra.mxu0 %v3273_v32  ;;  %v3365_v32 = vld [vmem:[%s4817_s1 + $0x454] ss:$8 sps:$4 sm:$0xff]  }
  0x50   :  { %2235 = vmatprep.subr.bf16.mxu0 %v3281_v33  ;;  %v3360_v33 = vld [vmem:[%s4817_s1 + $0x560] ss:$8 sps:$4 sm:$0xff]  }
  0x51   :  { %2275 = vmatpush1.bf16.msra.mxu1 %v3276_v34  ;;  %v450_v34 = vrot.slane %v428_v31, %v3850_v48  ;;  %v3441_v31 = vld [vmem:[%s4817_s1 + $0x480] ss:$8 sps:$4 sm:$0xff]  }
  0x52   :  { %2276 = vmatprep.subr.bf16.mxu1 %v3284_v35  ;;  %v3368_v35 = vld [vmem:[%s4817_s1 + $0x554] ss:$8 sps:$4 sm:$0xff]  }
  0x53   :  { %2236 = vmatpush1.bf16.msra.mxu0 %v3279_v36  ;;  %v3363_v36 = vld [vmem:[%s4817_s1 + $0x450] ss:$8 sps:$4 sm:$0xff]  }
  0x54   :  { %2237 = vmatprep.subr.bf16.mxu0 %v3287_v37  ;;  %v460_v37 = vcombine.high %v450_v34, %v450_v34 }
  0x55   :  { %2277 = vmatpush1.bf16.msra.mxu1 %v3282_v38  ;;  %v3371_v38 = vld [vmem:[%s4817_s1 + $0x444] ss:$8 sps:$4 sm:$0xff]  }
  0x56   :  { %2278 = vmatprep.subr.bf16.mxu1 %v3290_v39  ;;  %v3366_v39 = vld [vmem:[%s4817_s1 + $0x550] ss:$8 sps:$4 sm:$0xff]  }
  0x57   :  { %2238 = vmatpush1.bf16.msra.mxu0 %v3285_v40  ;;  %v3374_v40 = vld [vmem:[%s4817_s1 + $0x544] ss:$8 sps:$4 sm:$0xff]  }
  0x58   :  { %2239 = vmatprep.subr.bf16.mxu0 %v3293_v41  ;;  %v3369_v41 = vld [vmem:[%s4817_s1 + $0x440] ss:$8 sps:$4 sm:$0xff]  }
  0x59   :  { %2279 = vmatpush1.bf16.msra.mxu1 %v3288_v43  ;;  %v3377_v43 = vld [vmem:[%s4817_s1 + $0x434] ss:$8 sps:$4 sm:$0xff]  }
  0x5a   :  { %2280 = vmatprep.subr.bf16.mxu1 %v3296_v44  ;;  %v3372_v44 = vld [vmem:[%s4817_s1 + $0x540] ss:$8 sps:$4 sm:$0xff]  }
  0x5b   :  { %2240 = vmatpush1.bf16.msra.mxu0 %v3291_v45  ;;  %v3380_v45 = vld [vmem:[%s4817_s1 + $0x534] ss:$8 sps:$4 sm:$0xff]  }
  0x5c   :  { %2241 = vmatprep.subr.bf16.mxu0 %v3299_v46  ;;  %v3375_v46 = vld [vmem:[%s4817_s1 + $0x430] ss:$8 sps:$4 sm:$0xff]  }
  0x5d   :  { %2281 = vmatpush1.bf16.msra.mxu1 %v3294_v47  ;;  %v3383_v47 = vld [vmem:[%s4817_s1 + $0x424] ss:$8 sps:$4 sm:$0xff]  }
  0x5e   :  { %2282 = vmatprep.subr.bf16.mxu1 %v3302_v49  ;;  %v3378_v49 = vld [vmem:[%s4817_s1 + $0x530] ss:$8 sps:$4 sm:$0xff]  }
  0x5f   :  { %2242 = vmatpush1.bf16.msra.mxu0 %v3297_v50  ;;  %v3386_v50 = vld [vmem:[%s4817_s1 + $0x524] ss:$8 sps:$4 sm:$0xff]  }
  0x60   :  { %2243 = vmatprep.subr.bf16.mxu0 %v3305_v51  ;;  %v3381_v51 = vld [vmem:[%s4817_s1 + $0x420] ss:$8 sps:$4 sm:$0xff]  }
  0x61   :  { %2283 = vmatpush1.bf16.msra.mxu1 %v3300_v52  ;;  %v3389_v52 = vld [vmem:[%s4817_s1 + $0x414] ss:$8 sps:$4 sm:$0xff]  }
  0x62   :  { %2284 = vmatprep.subr.bf16.mxu1 %v3308_v53  ;;  %v3384_v53 = vld [vmem:[%s4817_s1 + $0x520] ss:$8 sps:$4 sm:$0xff]  }
  0x63   :  { %2244 = vmatpush2.bf16.msra.mxu0 %v3303_v54  ;;  %v3392_v54 = vld [vmem:[%s4817_s1 + $0x514] ss:$8 sps:$4 sm:$0xff]  }
  0x64   :  { %2245 = vmatprep.subr.bf16.mxu0 %v3311_v55  ;;  %v3387_v55 = vld [vmem:[%s4817_s1 + $0x410] ss:$8 sps:$4 sm:$0xff]  }
  0x65   :  { %2285 = vmatpush2.bf16.msra.mxu1 %v3306_v56  ;;  %v3395_v56 = vld [vmem:[%s4817_s1 + $0x404] ss:$8 sps:$4 sm:$0xff]  }
  0x66   :  { %2286 = vmatprep.subr.bf16.mxu1 %v3314_v57  ;;  %v3390_v57 = vld [vmem:[%s4817_s1 + $0x510] ss:$8 sps:$4 sm:$0xff]  }
  0x67   :  { %2246 = vmatpush2.bf16.msra.mxu0 %v3309_v58  ;;  %v3398_v58 = vld [vmem:[%s4817_s1 + $0x504] ss:$8 sps:$4 sm:$0xff]  }
  0x68   :  { %2247 = vmatprep.subr.bf16.mxu0 %v3317_v59  ;;  %v3393_v59 = vld [vmem:[%s4817_s1 + $0x400] ss:$8 sps:$4 sm:$0xff]  }
  0x69   :  { %2287 = vmatpush2.bf16.msra.mxu1 %v3312_v60  ;;  %v3401_v60 = vld [vmem:[%s4817_s1 + $0x4f4] ss:$8 sps:$4 sm:$0xff]  }
  0x6a   :  { %2288 = vmatprep.subr.bf16.mxu1 %v3320_v61  ;;  %v3396_v61 = vld [vmem:[%s4817_s1 + $0x500] ss:$8 sps:$4 sm:$0xff]  }
  0x6b   :  { %2248 = vmatpush2.bf16.msra.mxu0 %v3315_v62  ;;  %v3404_v62 = vld [vmem:[%s4817_s1 + $0x5f4] ss:$8 sps:$4 sm:$0xff]  }
  0x6c   :  { %2249 = vmatprep.subr.bf16.mxu0 %v3323_v63  ;;  %v3399_v63 = vld [vmem:[%s4817_s1 + $0x4f0] ss:$8 sps:$4 sm:$0xff]  }
  0x6d   :  { %2289 = vmatpush2.bf16.msra.mxu1 %v3318_v0  ;;  %v3407_v0 = vld [vmem:[%s4817_s1 + $0x4e4] ss:$8 sps:$4 sm:$0xff]  }
  0x6e   :  { %2290 = vmatprep.subr.bf16.mxu1 %v3326_v1  ;;  %v3402_v1 = vld [vmem:[%s4817_s1 + $0x5f0] ss:$8 sps:$4 sm:$0xff]  }
  0x6f   :  { %2250 = vmatpush2.bf16.msra.mxu0 %v3321_v2  ;;  %v3410_v2 = vld [vmem:[%s4817_s1 + $0x5e4] ss:$8 sps:$4 sm:$0xff]  }
  0x70   :  { %2251 = vmatprep.subr.bf16.mxu0 %v3329_v3  ;;  %v3405_v3 = vld [vmem:[%s4817_s1 + $0x4e0] ss:$8 sps:$4 sm:$0xff]  }
  0x71   :  { %2291 = vmatpush2.bf16.msra.mxu1 %v3324_v4  ;;  %v3413_v4 = vld [vmem:[%s4817_s1 + $0x4d4] ss:$8 sps:$4 sm:$0xff]  }
  0x72   :  { %2292 = vmatprep.subr.bf16.mxu1 %v3332_v6  ;;  %v3408_v6 = vld [vmem:[%s4817_s1 + $0x5e0] ss:$8 sps:$4 sm:$0xff]  }
  0x73   :  { %2252 = vmatpush2.bf16.msra.mxu0 %v3327_v7  ;;  %v3416_v7 = vld [vmem:[%s4817_s1 + $0x5d4] ss:$8 sps:$4 sm:$0xff]  }
  0x74   :  { %2253 = vmatprep.subr.bf16.mxu0 %v3335_v8  ;;  %v3411_v8 = vld [vmem:[%s4817_s1 + $0x4d0] ss:$8 sps:$4 sm:$0xff]  }
  0x75   :  { %2293 = vmatpush2.bf16.msra.mxu1 %v3330_v9  ;;  %v3419_v9 = vld [vmem:[%s4817_s1 + $0x4c4] ss:$8 sps:$4 sm:$0xff]  }
  0x76   :  { %2294 = vmatprep.subr.bf16.mxu1 %v3338_v10  ;;  %v3414_v10 = vld [vmem:[%s4817_s1 + $0x5d0] ss:$8 sps:$4 sm:$0xff]  }
  0x77   :  { %2254 = vmatpush2.bf16.msra.mxu0 %v3333_v11  ;;  %v3422_v11 = vld [vmem:[%s4817_s1 + $0x5c4] ss:$8 sps:$4 sm:$0xff]  }
  0x78   :  { %2255 = vmatprep.subr.bf16.mxu0 %v3341_v12  ;;  %v3417_v12 = vld [vmem:[%s4817_s1 + $0x4c0] ss:$8 sps:$4 sm:$0xff]  }
  0x79   :  { %2295 = vmatpush2.bf16.msra.mxu1 %v3336_v13  ;;  %v3425_v13 = vld [vmem:[%s4817_s1 + $0x4b4] ss:$8 sps:$4 sm:$0xff]  }
  0x7a   :  { %2296 = vmatprep.subr.bf16.mxu1 %v3344_v14  ;;  %v3420_v14 = vld [vmem:[%s4817_s1 + $0x5c0] ss:$8 sps:$4 sm:$0xff]  }
  0x7b   :  { %2256 = vmatpush2.bf16.msra.mxu0 %v3339_v15  ;;  %v3428_v15 = vld [vmem:[%s4817_s1 + $0x5b4] ss:$8 sps:$4 sm:$0xff]  }
  0x7c   :  { %2257 = vmatprep.subr.bf16.mxu0 %v3347_v16  ;;  %v3423_v16 = vld [vmem:[%s4817_s1 + $0x4b0] ss:$8 sps:$4 sm:$0xff]  }
  0x7d   :  { %2297 = vmatpush2.bf16.msra.mxu1 %v3342_v17  ;;  %v3431_v17 = vld [vmem:[%s4817_s1 + $0x4a4] ss:$8 sps:$4 sm:$0xff]  }
  0x7e   :  { %2298 = vmatprep.subr.bf16.mxu1 %v3350_v18  ;;  %v3426_v18 = vld [vmem:[%s4817_s1 + $0x5b0] ss:$8 sps:$4 sm:$0xff]  }
  0x7f   :  { %2258 = vmatpush2.bf16.msra.mxu0 %v3345_v19  ;;  %v413_v19 = vcombine.high %v4136_v26, %v4136_v26  ;;  %v3443_v26 = vld [vmem:[%s4817_s1 + $0x484] ss:$8 sps:$4 sm:$0xff]  }
  0x80   :  { %2309 = vmatprep.subr.bf16.mxu0 %v3353_v21  ;;  %v3429_v21 = vld [vmem:[%s4817_s1 + $0x4a0] ss:$8 sps:$4 sm:$0xff]  }
  0x81   :  { %2299 = vmatpush2.bf16.msra.mxu1 %v3348_v22  ;;  %v3437_v22 = vld [vmem:[%s4817_s1 + $0x494] ss:$8 sps:$4 sm:$0xff]  }
  0x82   :  { %2260 = vmatmul.mubr.bf16.vlgmr.msra.gmra.mxu0 %v394_v20  ;;  %2350 = vmatprep.subr.bf16.mxu1 %v3356_v23  ;;  %v3434_v20 = vld [vmem:[%s4817_s1 + $0x5a4] ss:$8 sps:$4 sm:$0xff]   ;;  %v3432_v23 = vld [vmem:[%s4817_s1 + $0x5a0] ss:$8 sps:$4 sm:$0xff]  }
  0x83   :  { %2310 = vmatpush1.bf16.msra.mxu0 %v3351_v24  ;;  %2341 = vmatprep.mubr.bf16.mxu0 %v450_v34  ;;  %v4307_v24 = vrot.slane %v413_v19, %v3850_v48  ;;  %v3444_v34 = vld [vmem:[%s4817_s1 + $0x580] ss:$8 sps:$4 sm:$0xff]  }
  0x84   :  { %2301 = vmatmul.mubr.bf16.vlgmr.msra.gmra.mxu1 %v410_v5  ;;  %2311 = vmatprep.subr.bf16.mxu0 %v3359_v25  ;;  %v3440_v5 = vld [vmem:[%s4817_s1 + $0x594] ss:$8 sps:$4 sm:$0xff]   ;;  %v3435_v25 = vld [vmem:[%s4817_s1 + $0x490] ss:$8 sps:$4 sm:$0xff]  }
  0x85   :  { %2351 = vmatpush1.bf16.msra.mxu1 %v3354_v27  ;;  %2382 = vmatprep.mubr.bf16.mxu1 %v460_v37  ;;  %v3438_v27 = vld [vmem:[%s4817_s1 + $0x590] ss:$8 sps:$4 sm:$0xff]  }
  0x86   :  { %2352 = vmatprep.subr.bf16.mxu1 %v3362_v29  ;;  %v429_v29 = vcombine.high %v4307_v24, %v4307_v24 }
  0x87   :  { %2312 = vmatpush1.bf16.msra.mxu0 %v3357_v30  ;;  %v3446_v30 = vld [vmem:[%s4817_s1 + $0x584] ss:$8 sps:$4 sm:$0xff]  }
  0x88   :  { %2313 = vmatprep.subr.bf16.mxu0 %v3365_v32  ;;  %v436_v32 = vrot.slane %v4143_v28, %v3850_v48  ;;  %v3447_v28 = vld [vmem:[%s4817_s1 + $0x670] ss:$8 sps:$4 sm:$0xff]  }
  0x89   :  { %2353 = vmatpush1.bf16.msra.mxu1 %v3360_v33  ;;  %v3449_v33 = vld [vmem:[%s4817_s1 + $0x674] ss:$8 sps:$4 sm:$0xff]  }
  0x8a   :  { %2354 = vmatprep.subr.bf16.mxu1 %v3368_v35  ;;  %v457_v35 = vrot.slane %v429_v29, %v3850_v48  ;;  %v458_v37 = vcombine.high %v436_v32, %v436_v32 }
  0x8b   :  { %2314 = vmatpush1.bf16.msra.mxu0 %v3363_v36  ;;  %v3452_v36 = vld [vmem:[%s4817_s1 + $0x774] ss:$8 sps:$4 sm:$0xff]  }
  0x8c   :  { %2315 = vmatprep.subr.bf16.mxu0 %v3371_v38  ;;  %v3455_v38 = vld [vmem:[%s4817_s1 + $0x664] ss:$8 sps:$4 sm:$0xff]  }
  0x8d   :  { %2355 = vmatpush1.bf16.msra.mxu1 %v3366_v39  ;;  %v3450_v39 = vld [vmem:[%s4817_s1 + $0x770] ss:$8 sps:$4 sm:$0xff]  }
  0x8e   :  { %2356 = vmatprep.subr.bf16.mxu1 %v3374_v40  ;;  %v461_v40 = vcombine.high %v457_v35, %v457_v35 }
  0x8f   :  { %2316 = vmatpush1.bf16.msra.mxu0 %v3369_v41  ;;  %v3458_v41 = vld [vmem:[%s4817_s1 + $0x764] ss:$8 sps:$4 sm:$0xff]  }
  0x90   :  { %2317 = vmatprep.subr.bf16.mxu0 %v3377_v43  ;;  %v3453_v43 = vld [vmem:[%s4817_s1 + $0x660] ss:$8 sps:$4 sm:$0xff]  }
  0x91   :  { %2357 = vmatpush1.bf16.msra.mxu1 %v3372_v44  ;;  %v3461_v44 = vld [vmem:[%s4817_s1 + $0x654] ss:$8 sps:$4 sm:$0xff]  }
  0x92   :  { %2358 = vmatprep.subr.bf16.mxu1 %v3380_v45  ;;  %v3456_v45 = vld [vmem:[%s4817_s1 + $0x760] ss:$8 sps:$4 sm:$0xff]  }
  0x93   :  { %2318 = vmatpush1.bf16.msra.mxu0 %v3375_v46  ;;  %v3464_v46 = vld [vmem:[%s4817_s1 + $0x754] ss:$8 sps:$4 sm:$0xff]  }
  0x94   :  { %2319 = vmatprep.subr.bf16.mxu0 %v3383_v47  ;;  %v3459_v47 = vld [vmem:[%s4817_s1 + $0x650] ss:$8 sps:$4 sm:$0xff]  }
  0x95   :  { %2359 = vmatpush1.bf16.msra.mxu1 %v3378_v49  ;;  %v3467_v49 = vld [vmem:[%s4817_s1 + $0x644] ss:$8 sps:$4 sm:$0xff]  }
  0x96   :  { %2360 = vmatprep.subr.bf16.mxu1 %v3386_v50  ;;  %v3462_v50 = vld [vmem:[%s4817_s1 + $0x750] ss:$8 sps:$4 sm:$0xff]  }
  0x97   :  { %2320 = vmatpush1.bf16.msra.mxu0 %v3381_v51  ;;  %v3470_v51 = vld [vmem:[%s4817_s1 + $0x744] ss:$8 sps:$4 sm:$0xff]  }
  0x98   :  { %2321 = vmatprep.subr.bf16.mxu0 %v3389_v52  ;;  %v3465_v52 = vld [vmem:[%s4817_s1 + $0x640] ss:$8 sps:$4 sm:$0xff]  }
  0x99   :  { %2361 = vmatpush1.bf16.msra.mxu1 %v3384_v53  ;;  %v3473_v53 = vld [vmem:[%s4817_s1 + $0x634] ss:$8 sps:$4 sm:$0xff]  }
  0x9a   :  { %2362 = vmatprep.subr.bf16.mxu1 %v3392_v54  ;;  %v3468_v54 = vld [vmem:[%s4817_s1 + $0x740] ss:$8 sps:$4 sm:$0xff]  }
  0x9b   :  { %2322 = vmatpush1.bf16.msra.mxu0 %v3387_v55  ;;  %v3476_v55 = vld [vmem:[%s4817_s1 + $0x734] ss:$8 sps:$4 sm:$0xff]  }
  0x9c   :  { %2323 = vmatprep.subr.bf16.mxu0 %v3395_v56  ;;  %v3471_v56 = vld [vmem:[%s4817_s1 + $0x630] ss:$8 sps:$4 sm:$0xff]  }
  0x9d   :  { %2363 = vmatpush1.bf16.msra.mxu1 %v3390_v57  ;;  %v3479_v57 = vld [vmem:[%s4817_s1 + $0x624] ss:$8 sps:$4 sm:$0xff]  }
  0x9e   :  { %2364 = vmatprep.subr.bf16.mxu1 %v3398_v58  ;;  %v3474_v58 = vld [vmem:[%s4817_s1 + $0x730] ss:$8 sps:$4 sm:$0xff]  }
  0x9f   :  { %2324 = vmatpush1.bf16.msra.mxu0 %v3393_v59  ;;  %v3482_v59 = vld [vmem:[%s4817_s1 + $0x724] ss:$8 sps:$4 sm:$0xff]  }
  0xa0   :  { %2325 = vmatprep.subr.bf16.mxu0 %v3401_v60  ;;  %v3477_v60 = vld [vmem:[%s4817_s1 + $0x620] ss:$8 sps:$4 sm:$0xff]  }
  0xa1   :  { %2365 = vmatpush1.bf16.msra.mxu1 %v3396_v61  ;;  %v3485_v61 = vld [vmem:[%s4817_s1 + $0x614] ss:$8 sps:$4 sm:$0xff]  }
  0xa2   :  { %2366 = vmatprep.subr.bf16.mxu1 %v3404_v62  ;;  %v3480_v62 = vld [vmem:[%s4817_s1 + $0x720] ss:$8 sps:$4 sm:$0xff]  }
  0xa3   :  { %2326 = vmatpush2.bf16.msra.mxu0 %v3399_v63  ;;  %v3488_v63 = vld [vmem:[%s4817_s1 + $0x714] ss:$8 sps:$4 sm:$0xff]  }
  0xa4   :  { %2327 = vmatprep.subr.bf16.mxu0 %v3407_v0  ;;  %v3483_v0 = vld [vmem:[%s4817_s1 + $0x610] ss:$8 sps:$4 sm:$0xff]  }
  0xa5   :  { %2367 = vmatpush2.bf16.msra.mxu1 %v3402_v1  ;;  %v3486_v1 = vld [vmem:[%s4817_s1 + $0x710] ss:$8 sps:$4 sm:$0xff]  }
  0xa6   :  { %2368 = vmatprep.subr.bf16.mxu1 %v3410_v2  ;;  %v3491_v2 = vld [vmem:[%s4817_s1 + $0x604] ss:$8 sps:$4 sm:$0xff]  }
  0xa7   :  { %2328 = vmatpush2.bf16.msra.mxu0 %v3405_v3  ;;  %v3489_v3 = vld [vmem:[%s4817_s1 + $0x600] ss:$8 sps:$4 sm:$0xff]  }
  0xa8   :  { %2329 = vmatprep.subr.bf16.mxu0 %v3413_v4  ;;  %v3494_v4 = vld [vmem:[%s4817_s1 + $0x704] ss:$8 sps:$4 sm:$0xff]  }
  0xa9   :  { %2369 = vmatpush2.bf16.msra.mxu1 %v3408_v6  ;;  %v3497_v6 = vld [vmem:[%s4817_s1 + $0x6f4] ss:$8 sps:$4 sm:$0xff]  }
  0xaa   :  { %2370 = vmatprep.subr.bf16.mxu1 %v3416_v7  ;;  %v3492_v7 = vld [vmem:[%s4817_s1 + $0x700] ss:$8 sps:$4 sm:$0xff]  }
  0xab   :  { %2330 = vmatpush2.bf16.msra.mxu0 %v3411_v8  ;;  %v3500_v8 = vld [vmem:[%s4817_s1 + $0x7f4] ss:$8 sps:$4 sm:$0xff]  }
  0xac   :  { %2331 = vmatprep.subr.bf16.mxu0 %v3419_v9  ;;  %v3495_v9 = vld [vmem:[%s4817_s1 + $0x6f0] ss:$8 sps:$4 sm:$0xff]  }
  0xad   :  { %2371 = vmatpush2.bf16.msra.mxu1 %v3414_v10  ;;  %v3503_v10 = vld [vmem:[%s4817_s1 + $0x6e4] ss:$8 sps:$4 sm:$0xff]  }
  0xae   :  { %2372 = vmatprep.subr.bf16.mxu1 %v3422_v11  ;;  %v3498_v11 = vld [vmem:[%s4817_s1 + $0x7f0] ss:$8 sps:$4 sm:$0xff]  }
  0xaf   :  { %2332 = vmatpush2.bf16.msra.mxu0 %v3417_v12  ;;  %v3506_v12 = vld [vmem:[%s4817_s1 + $0x7e4] ss:$8 sps:$4 sm:$0xff]  }
  0xb0   :  { %2333 = vmatprep.subr.bf16.mxu0 %v3425_v13  ;;  %v3501_v13 = vld [vmem:[%s4817_s1 + $0x6e0] ss:$8 sps:$4 sm:$0xff]  }
  0xb1   :  { %2373 = vmatpush2.bf16.msra.mxu1 %v3420_v14  ;;  %v3509_v14 = vld [vmem:[%s4817_s1 + $0x6d4] ss:$8 sps:$4 sm:$0xff]  }
  0xb2   :  { %2374 = vmatprep.subr.bf16.mxu1 %v3428_v15 }
  0xb3   :  { %2334 = vmatpush2.bf16.msra.mxu0 %v3423_v16 }
  0xb4   :  { %2335 = vmatprep.subr.bf16.mxu0 %v3431_v17 }
  0xb5   :  { %2375 = vmatpush2.bf16.msra.mxu1 %v3426_v18 }
  0xb6   :  { %2376 = vmatprep.subr.bf16.mxu1 %v3434_v20 }
  0xb7   :  { %2336 = vmatpush2.bf16.msra.mxu0 %v3429_v21 }
  0xb8   :  { %2337 = vmatprep.subr.bf16.mxu0 %v3437_v22 }
  0xb9   :  { %2377 = vmatpush2.bf16.msra.mxu1 %v3432_v23 }
  0xba   :  { %2378 = vmatprep.subr.bf16.mxu1 %v3440_v5 }
  0xbb   :  { %2338 = vmatpush2.bf16.msra.mxu0 %v3435_v25 }
  0xbc   :  { %2339 = vmatprep.subr.bf16.mxu0 %v3443_v26 }
  0xbd   :  { %2379 = vmatpush2.bf16.msra.mxu1 %v3438_v27 }
  0xbe   :  { %2380 = vmatprep.subr.bf16.mxu1 %v3446_v30 }
  0xbf   :  { %2340 = vmatpush2.bf16.msra.mxu0 %v3441_v31 }
  0xc0   :  { %2391 = vmatprep.subr.bf16.mxu0 %v3449_v33 }
  0xc1   :  { %2381 = vmatpush2.bf16.msra.mxu1 %v3444_v34 }
  0xc2   :  { %2342 = vmatmul.mubr.bf16.vlgmr.msra.gmra.mxu0 %v436_v32  ;;  %2432 = vmatprep.subr.bf16.mxu1 %v3452_v36 }
  0xc3   :  { %2392 = vmatpush1.bf16.msra.mxu0 %v3447_v28  ;;  %2423 = vmatprep.mubr.bf16.mxu0 %v457_v35 }
  0xc4   :  { %2383 = vmatmul.mubr.bf16.vlgmr.msra.gmra.mxu1 %v458_v37  ;;  %2393 = vmatprep.subr.bf16.mxu0 %v3455_v38 }
  0xc5   :  { %2433 = vmatpush1.bf16.msra.mxu1 %v3450_v39  ;;  %2464 = vmatprep.mubr.bf16.mxu1 %v461_v40 }
  0xc6   :  { %2434 = vmatprep.subr.bf16.mxu1 %v3458_v41 }
  0xc7   :  { %2394 = vmatpush1.bf16.msra.mxu0 %v3453_v43 }
  0xc8   :  { %2395 = vmatprep.subr.bf16.mxu0 %v3461_v44 }
  0xc9   :  { %2435 = vmatpush1.bf16.msra.mxu1 %v3456_v45 }
  0xca   :  { %2436 = vmatprep.subr.bf16.mxu1 %v3464_v46 }
  0xcb   :  { %2396 = vmatpush1.bf16.msra.mxu0 %v3459_v47 }
  0xcc   :  { %2397 = vmatprep.subr.bf16.mxu0 %v3467_v49 }
  0xcd   :  { %2437 = vmatpush1.bf16.msra.mxu1 %v3462_v50 }
  0xce   :  { %2438 = vmatprep.subr.bf16.mxu1 %v3470_v51 }
  0xcf   :  { %2398 = vmatpush1.bf16.msra.mxu0 %v3465_v52 }
  0xd0   :  { %2399 = vmatprep.subr.bf16.mxu0 %v3473_v53 }
  0xd1   :  { %2439 = vmatpush1.bf16.msra.mxu1 %v3468_v54 }
  0xd2   :  { %2440 = vmatprep.subr.bf16.mxu1 %v3476_v55 }
  0xd3   :  { %2400 = vmatpush1.bf16.msra.mxu0 %v3471_v56 }
  0xd4   :  { %2401 = vmatprep.subr.bf16.mxu0 %v3479_v57 }
  0xd5   :  { %2441 = vmatpush1.bf16.msra.mxu1 %v3474_v58 }
  0xd6   :  { %2442 = vmatprep.subr.bf16.mxu1 %v3482_v59 }
  0xd7   :  { %2402 = vmatpush1.bf16.msra.mxu0 %v3477_v60 }
  0xd8   :  { %2403 = vmatprep.subr.bf16.mxu0 %v3485_v61 }
  0xd9   :  { %2443 = vmatpush1.bf16.msra.mxu1 %v3480_v62 }
  0xda   :  { %2444 = vmatprep.subr.bf16.mxu1 %v3488_v63 }
  0xdb   :  { %2404 = vmatpush1.bf16.msra.mxu0 %v3483_v0 }
  0xdc   :  { %2405 = vmatprep.subr.bf16.mxu0 %v3491_v2 }
  0xdd   :  { %2445 = vmatpush1.bf16.msra.mxu1 %v3486_v1 }
  0xde   :  { %2446 = vmatprep.subr.bf16.mxu1 %v3494_v4 }
  0xdf   :  { %2406 = vmatpush1.bf16.msra.mxu0 %v3489_v3 }
  0xe0   :  { %2407 = vmatprep.subr.bf16.mxu0 %v3497_v6 }
  0xe1   :  { %2447 = vmatpush1.bf16.msra.mxu1 %v3492_v7 }
  0xe2   :  { %2448 = vmatprep.subr.bf16.mxu1 %v3500_v8 }
  0xe3   :  { %2408 = vmatpush2.bf16.msra.mxu0 %v3495_v9 }
  0xe4   :  { %2409 = vmatprep.subr.bf16.mxu0 %v3503_v10 }
  0xe5   :  { %10 = vsyncpa [#allocation3], 0  ;;  %2449 = vmatpush2.bf16.msra.mxu1 %v3498_v11  ;;  %v3504_v15 = vld [vmem:[%s4817_s1 + $0x7e0] ss:$8 sps:$4 sm:$0xff]   ;;  %v3512_v16 = vld [vmem:[%s4817_s1 + $0x7d4] ss:$8 sps:$4 sm:$0xff]   ;;  %v443_v44 = vrot.slane %v4307_v24, %v3850_v48 }
  0xe6   :  { %2450 = vmatprep.subr.bf16.mxu1 %v3506_v12  ;;  %v3507_v17 = vld [vmem:[%s4817_s1 + $0x6d0] ss:$8 sps:$4 sm:$0xff]   ;;  %v3515_v18 = vld [vmem:[%s4817_s1 + $0x6c4] ss:$8 sps:$4 sm:$0xff]   ;;  %v3513_v21 = vld [vmem:[%s4817_s1 + $0x6c0] ss:$8 sps:$4 sm:$0xff]  }
  0xe7   :  { %2410 = vmatpush2.bf16.msra.mxu0 %v3501_v13  ;;  %v3510_v19 = vld [vmem:[%s4817_s1 + $0x7d0] ss:$8 sps:$4 sm:$0xff]   ;;  %v3518_v20 = vld [vmem:[%s4817_s1 + $0x7c4] ss:$8 sps:$4 sm:$0xff]   ;;  %v3521_v22 = vld [vmem:[%s4817_s1 + $0x6b4] ss:$8 sps:$4 sm:$0xff]   ;;  %v459_v52 = vcombine.high %v443_v44, %v443_v44 }
  0xe8   :  { %2411 = vmatprep.subr.bf16.mxu0 %v3509_v14  ;;  %v3516_v23 = vld [vmem:[%s4817_s1 + $0x7c0] ss:$8 sps:$4 sm:$0xff]   ;;  %v3524_v5 = vld [vmem:[%s4817_s1 + $0x7b4] ss:$8 sps:$4 sm:$0xff]   ;;  %v3519_v25 = vld [vmem:[%s4817_s1 + $0x6b0] ss:$8 sps:$4 sm:$0xff]  }
  0xe9   :  { %2451 = vmatpush2.bf16.msra.mxu1 %v3504_v15  ;;  %v3527_v26 = vld [vmem:[%s4817_s1 + $0x6a4] ss:$8 sps:$4 sm:$0xff]   ;;  %v3522_v27 = vld [vmem:[%s4817_s1 + $0x7b0] ss:$8 sps:$4 sm:$0xff]   ;;  %v3525_v31 = vld [vmem:[%s4817_s1 + $0x6a0] ss:$8 sps:$4 sm:$0xff]  }
  0xea   :  { %2452 = vmatprep.subr.bf16.mxu1 %v3512_v16  ;;  %v3530_v29 = vld [vmem:[%s4817_s1 + $0x7a4] ss:$8 sps:$4 sm:$0xff]   ;;  %v4500_v30 = vld [vmem:[%s4816_s0 + $0x10] sm:$0x1f]  ;;  %v3528_v33 = vld [vmem:[%s4817_s1 + $0x7a0] ss:$8 sps:$4 sm:$0xff]  }
  0xeb   :  { %2412 = vmatpush2.bf16.msra.mxu0 %v3507_v17  ;;  %v3533_v32 = vld [vmem:[%s4817_s1 + $0x694] ss:$8 sps:$4 sm:$0xff]   ;;  %v4513_v34 = vrot.slane %v4500_v30, %v3850_v48  ;;  %v3531_v36 = vld [vmem:[%s4817_s1 + $0x690] ss:$8 sps:$4 sm:$0xff]   ;;  %v3539_v28 = vld [vmem:[%s4817_s1 + $0x684] ss:$8 sps:$4 sm:$0xff]  }
  0xec   :  { %2413 = vmatprep.subr.bf16.mxu0 %v3515_v18  ;;  %v3536_v35 = vld [vmem:[%s4817_s1 + $0x794] ss:$8 sps:$4 sm:$0xff]   ;;  %v3534_v37 = vld [vmem:[%s4817_s1 + $0x790] ss:$8 sps:$4 sm:$0xff]   ;;  %v3542_v39 = vld [vmem:[%s4817_s1 + $0x784] ss:$8 sps:$4 sm:$0xff]  }
  0xed   :  { %2453 = vmatpush2.bf16.msra.mxu1 %v3510_v19  ;;  %v477_v38 = vcombine.high %v4513_v34, %v4513_v34  ;;  %v3537_v40 = vld [vmem:[%s4817_s1 + $0x680] ss:$8 sps:$4 sm:$0xff]   ;;  %v353_v41 = vsub.s32 0, %v3835_v42  ;;  %v3546_v45 = vld [vmem:[%s4817_s1 + $0x874] ss:$8 sps:$4 sm:$0xff]   ;;  %v357_v47 = vsub.s32 1, %v3835_v42 }
  0xee   :  { %2454 = vmatprep.subr.bf16.mxu1 %v3518_v20  ;;  %v349_v43 = vld [vmem:[%s4818_s2] sm:$0x3]  ;;  %v3549_v50 = vld [vmem:[%s4817_s1 + $0x974] ss:$8 sps:$4 sm:$0xff]   ;;  %v3544_v51 = vld [vmem:[%s4817_s1 + $0x870] ss:$8 sps:$4 sm:$0xff]  }
  0xef   :  { %2414 = vmatpush2.bf16.msra.mxu0 %v3513_v21  ;;  %v3540_v46 = vld [vmem:[%s4817_s1 + $0x780] ss:$8 sps:$4 sm:$0xff]   ;;  %v498_v49 = vrot.slane %v477_v38, %v3850_v48  ;;  %v354_v24 = vrot.slane %v349_v43, %v353_v41  ;;  %v3552_v53 = vld [vmem:[%s4817_s1 + $0x864] ss:$8 sps:$4 sm:$0xff]   ;;  %v3547_v42 = vld [vmem:[%s4817_s1 + $0x970] ss:$8 sps:$4 sm:$0xff]   ;;  %v358_v54 = vrot.slane %v349_v43, %v357_v47 }
  0xf0   :  { %2415 = vmatprep.subr.bf16.mxu0 %v3521_v22  ;;  %v3555_v57 = vld [vmem:[%s4817_s1 + $0x964] ss:$8 sps:$4 sm:$0xff]   ;;  %v3550_v59 = vld [vmem:[%s4817_s1 + $0x860] ss:$8 sps:$4 sm:$0xff]   ;;  %v3558_v62 = vld [vmem:[%s4817_s1 + $0x854] ss:$8 sps:$4 sm:$0xff]  }
  0xf1   :  { %2455 = vmatpush2.bf16.msra.mxu1 %v3516_v23  ;;  %v500_v55 = vcombine.high %v498_v49, %v498_v49  ;;  %v3553_v1 = vld [vmem:[%s4817_s1 + $0x960] ss:$8 sps:$4 sm:$0xff]   ;;  %v3561_v4 = vld [vmem:[%s4817_s1 + $0x954] ss:$8 sps:$4 sm:$0xff]   ;;  %v3556_v7 = vld [vmem:[%s4817_s1 + $0x850] ss:$8 sps:$4 sm:$0xff]  }
  0xf2   :  { %2456 = vmatprep.subr.bf16.mxu1 %v3524_v5  ;;  %v3564_v10 = vld [vmem:[%s4817_s1 + $0x844] ss:$8 sps:$4 sm:$0xff]   ;;  %v3559_v11 = vld [vmem:[%s4817_s1 + $0x950] ss:$8 sps:$4 sm:$0xff]   ;;  %v3562_v14 = vld [vmem:[%s4817_s1 + $0x840] ss:$8 sps:$4 sm:$0xff]  }
  0xf3   :  { %2416 = vmatpush2.bf16.msra.mxu0 %v3519_v25  ;;  %v3567_v13 = vld [vmem:[%s4817_s1 + $0x944] ss:$8 sps:$4 sm:$0xff]   ;;  %v3570_v15 = vld [vmem:[%s4817_s1 + $0x834] ss:$8 sps:$4 sm:$0xff]   ;;  %v3565_v16 = vld [vmem:[%s4817_s1 + $0x940] ss:$8 sps:$4 sm:$0xff]  }
  0xf4   :  { %2417 = vmatprep.subr.bf16.mxu0 %v3527_v26  ;;  %v3573_v17 = vld [vmem:[%s4817_s1 + $0x934] ss:$8 sps:$4 sm:$0xff]   ;;  %v3568_v18 = vld [vmem:[%s4817_s1 + $0x830] ss:$8 sps:$4 sm:$0xff]   ;;  %v3576_v19 = vld [vmem:[%s4817_s1 + $0x824] ss:$8 sps:$4 sm:$0xff]  }
  0xf5   :  { %2457 = vmatpush2.bf16.msra.mxu1 %v3522_v27  ;;  %v3571_v20 = vld [vmem:[%s4817_s1 + $0x930] ss:$8 sps:$4 sm:$0xff]   ;;  %v3579_v21 = vld [vmem:[%s4817_s1 + $0x924] ss:$8 sps:$4 sm:$0xff]   ;;  %v3574_v22 = vld [vmem:[%s4817_s1 + $0x820] ss:$8 sps:$4 sm:$0xff]  }
  0xf6   :  { %2458 = vmatprep.subr.bf16.mxu1 %v3530_v29  ;;  %v3582_v23 = vld [vmem:[%s4817_s1 + $0x814] ss:$8 sps:$4 sm:$0xff]   ;;  %v3577_v5 = vld [vmem:[%s4817_s1 + $0x920] ss:$8 sps:$4 sm:$0xff]   ;;  %v3580_v26 = vld [vmem:[%s4817_s1 + $0x810] ss:$8 sps:$4 sm:$0xff]  }
  0xf7   :  { %2418 = vmatpush2.bf16.msra.mxu0 %v3525_v31  ;;  %v3585_v25 = vld [vmem:[%s4817_s1 + $0x914] ss:$8 sps:$4 sm:$0xff]   ;;  %v3588_v27 = vld [vmem:[%s4817_s1 + $0x804] ss:$8 sps:$4 sm:$0xff]   ;;  %v3583_v29 = vld [vmem:[%s4817_s1 + $0x910] ss:$8 sps:$4 sm:$0xff]  }
  0xf8   :  { %2419 = vmatprep.subr.bf16.mxu0 %v3533_v32  ;;  %v3591_v31 = vld [vmem:[%s4817_s1 + $0x904] ss:$8 sps:$4 sm:$0xff]   ;;  %v3586_v32 = vld [vmem:[%s4817_s1 + $0x800] ss:$8 sps:$4 sm:$0xff]   ;;  %v3595_v38 = vld [vmem:[%s4817_s1 + $0x9f0] ss:$8 sps:$4 sm:$0xff]  }
  0xf9   :  { %2459 = vmatpush2.bf16.msra.mxu1 %v3528_v33  ;;  %v3594_v33 = vld [vmem:[%s4817_s1 + $0x8f4] ss:$8 sps:$4 sm:$0xff]   ;;  %v3601_v43 = vld [vmem:[%s4817_s1 + $0x9e0] ss:$8 sps:$4 sm:$0xff]   ;;  %v3607_v47 = vld [vmem:[%s4817_s1 + $0x9d0] ss:$8 sps:$4 sm:$0xff]  }
  0xfa   :  { %2460 = vmatprep.subr.bf16.mxu1 %v3536_v35  ;;  %v3589_v35 = vld [vmem:[%s4817_s1 + $0x900] ss:$8 sps:$4 sm:$0xff]   ;;  %v3606_v41 = vld [vmem:[%s4817_s1 + $0x8d4] ss:$8 sps:$4 sm:$0xff]   ;;  %vm2141_vm0 = vcmask 261120   ;;  %s3687_s16 = smov [#allocation2]  }
  0xfb   :  { %2420 = vmatpush2.bf16.msra.mxu0 %v3531_v36  ;;  %v3597_v36 = vld [vmem:[%s4817_s1 + $0x9f4] ss:$8 sps:$4 sm:$0xff]   ;;  %s2783_s17 = sshll.u32 %s3687_s16, 4  ;;  %vm2775_vm1 = vcmask 41984   ;;  %s2784_s17 = int_to_ptr.vmem [resolvable:$true] %s2783_s17 }
  0xfc   :  { %2421 = vmatprep.subr.bf16.mxu0 %v3539_v28  ;;  %v3592_v28 = vld [vmem:[%s4817_s1 + $0x8f0] ss:$8 sps:$4 sm:$0xff]   ;;  %s3663_s18 = scalar_lea.vmem %s2784_s17, 32  ;;  %p3668_p1 = scmp.lt.s32.totalorder %s2784_s17, %s2784_s17 }
  0xfd   :  { %2461 = vmatpush2.bf16.msra.mxu1 %v3534_v37  ;;  %v3600_v37 = vld [vmem:[%s4817_s1 + $0x8e4] ss:$8 sps:$4 sm:$0xff]   ;;  %p3664_p0 = scmp.ne.s32.totalorder %s2784_s17, %s3663_s18  ;;  %p3669_p2 = scmp.lt.s32.totalorder %s3663_s18, %s3663_s18 }
  0xfe   :  { %2462 = vmatprep.subr.bf16.mxu1 %v3542_v39  ;;  %v3603_v39 = vld [vmem:[%s4817_s1 + $0x9e4] ss:$8 sps:$4 sm:$0xff]  }
  0xff   :  { %2422 = vmatpush2.bf16.msra.mxu0 %v3537_v40  ;;  %v3598_v40 = vld [vmem:[%s4817_s1 + $0x8e0] ss:$8 sps:$4 sm:$0xff]   ;;  %p3670_p3 = por %p3669_p2, %p3668_p1 }
 0x100   :  { %2473 = vmatprep.subr.bf16.mxu0 %v3546_v45  ;;  %v3604_v45 = vld [vmem:[%s4817_s1 + $0x8d0] ss:$8 sps:$4 sm:$0xff]  }
 0x101   :  { %2463 = vmatpush2.bf16.msra.mxu1 %v3540_v46  ;;  %v3612_v46 = vld [vmem:[%s4817_s1 + $0x8c4] ss:$8 sps:$4 sm:$0xff]   ;;  %p3671_p4 = pnand %p3670_p3, %p3664_p0 }
 0x102   :  { %v2179_v56 = vpop.f32.mrf.mxu0  ;;  %2424 = vmatmul.mubr.bf16.vlgmr.msra.gmra.mxu0 %v443_v44  ;;  %2514 = vmatprep.subr.bf16.mxu1 %v3549_v50  ;;  %v3609_v44 = vld [vmem:[%s4817_s1 + $0x9d4] ss:$8 sps:$4 sm:$0xff]   ;;  %v3610_v50 = vld [vmem:[%s4817_s1 + $0x8c0] ss:$8 sps:$4 sm:$0xff]  }
 0x103   :  { %v2180_v58 = vadd.f32 %v2179_v56, %v354_v24  ;;  %2474 = vmatpush1.bf16.msra.mxu0 %v3544_v51  ;;  %2505 = vmatprep.mubr.bf16.mxu0 %v498_v49  ;;  %v3615_v49 = vld [vmem:[%s4817_s1 + $0x9c4] ss:$8 sps:$4 sm:$0xff]   ;;  %v3618_v24 = vld [vmem:[%s4817_s1 + $0x8b4] ss:$8 sps:$4 sm:$0xff]   ;;  %v3613_v51 = vld [vmem:[%s4817_s1 + $0x9c0] ss:$8 sps:$4 sm:$0xff]  }
 0x104   :  { %v2181_v60 = vpop.f32.mrf.mxu0  ;;  %v2220_v61 = vpop.f32.mrf.mxu1  ;;  %2465 = vmatmul.mubr.bf16.vlgmr.msra.gmra.mxu1 %v459_v52  ;;  %2475 = vmatprep.subr.bf16.mxu0 %v3552_v53  ;;  %v3621_v52 = vld [vmem:[%s4817_s1 + $0x9b4] ss:$8 sps:$4 sm:$0xff]   ;;  %v3616_v53 = vld [vmem:[%s4817_s1 + $0x8b0] ss:$8 sps:$4 sm:$0xff]   ;;  %v3622_v56 = vld [vmem:[%s4817_s1 + $0x8a0] ss:$8 sps:$4 sm:$0xff]  }
 0x105   :  { %v2182_v63 = vadd.f32 %v2181_v60, %v358_v54  ;;  %v4570_v0 = vadd.f32 %v2220_v61, %v2180_v58  ;;  %2515 = vmatpush1.bf16.msra.mxu1 %v3547_v42  ;;  %2546 = vmatprep.mubr.bf16.mxu1 %v500_v55  ;;  %v3624_v42 = vld [vmem:[%s4817_s1 + $0x8a4] ss:$8 sps:$4 sm:$0xff]   ;;  %v3619_v54 = vld [vmem:[%s4817_s1 + $0x9b0] ss:$8 sps:$4 sm:$0xff]   ;;  %v3625_v58 = vld [vmem:[%s4817_s1 + $0x9a0] ss:$8 sps:$4 sm:$0xff]  }
 0x106   :  { %v2183_v2 = vpop.f32.mrf.mxu0  ;;  %v2222_v3 = vpop.f32.mrf.mxu1  ;;  %2516 = vmatprep.subr.bf16.mxu1 %v3555_v57  ;;  %v3627_v55 = vld [vmem:[%s4817_s1 + $0x9a4] ss:$8 sps:$4 sm:$0xff]   ;;  %v3630_v57 = vld [vmem:[%s4817_s1 + $0x894] ss:$8 sps:$4 sm:$0xff]   ;;  %v3628_v60 = vld [vmem:[%s4817_s1 + $0x890] ss:$8 sps:$4 sm:$0xff]  }
 0x107   :  { %v4578_v6 = vadd.f32 %v2222_v3, %v2182_v63  ;;  %2476 = vmatpush1.bf16.msra.mxu0 %v3550_v59  ;;  %v3633_v59 = vld [vmem:[%s4817_s1 + $0x994] ss:$8 sps:$4 sm:$0xff]   ;;  %v3636_v61 = vld [vmem:[%s4817_s1 + $0x884] ss:$8 sps:$4 sm:$0xff]   ;;  %v484_v2 = vrot.slane %v4513_v34, %v3850_v48 }
 0x108   :  { %v2184_v8 = vpop.f32.mrf.mxu0  ;;  %v2224_v9 = vpop.f32.mrf.mxu1  ;;  %2477 = vmatprep.subr.bf16.mxu0 %v3558_v62  ;;  %v3631_v62 = vld [vmem:[%s4817_s1 + $0x990] ss:$8 sps:$4 sm:$0xff]   ;;  %v3639_v63 = vld [vmem:[%s4817_s1 + $0x984] ss:$8 sps:$4 sm:$0xff]   ;;  %v3643_v3 = vld [vmem:[%s4817_s1 + $0xa14] ss:$8 sps:$4 sm:$0xff]  }
 0x109   :  { %2517 = vmatpush1.bf16.msra.mxu1 %v3553_v1  ;;  %v3634_v1 = vld [vmem:[%s4817_s1 + $0x880] ss:$8 sps:$4 sm:$0xff]   ;;  %v3641_v8 = vld [vmem:[%s4817_s1 + $0xa10] ss:$8 sps:$4 sm:$0xff]   ;;  %v499_v34 = vcombine.high %v484_v2, %v484_v2  ;;  %v3646_v9 = vld [vmem:[%s4817_s1 + $0xa04] ss:$8 sps:$4 sm:$0xff]  }
 0x10a   :  { %v2225_v12 = vpop.f32.mrf.mxu1  ;;  %2518 = vmatprep.subr.bf16.mxu1 %v3561_v4  ;;  %v3637_v4 = vld [vmem:[%s4817_s1 + $0x980] ss:$8 sps:$4 sm:$0xff]  }
 0x10b   :  { %2478 = vmatpush1.bf16.msra.mxu0 %v3556_v7  ;;  %v462_v7 = vcombine.high %v4500_v30, %v4500_v30  ;;  %v3644_v30 = vld [vmem:[%s4817_s1 + $0xa00] ss:$8 sps:$4 sm:$0xff]  }
 0x10c   :  { %2479 = vmatprep.subr.bf16.mxu0 %v3564_v10 }
 0x10d   :  { %2519 = vmatpush1.bf16.msra.mxu1 %v3559_v11  ;;  %v476_v10 = vrot.slane %v462_v7, %v3850_v48 }
 0x10e   :  { %2520 = vmatprep.subr.bf16.mxu1 %v3567_v13  ;;  %v3686_v13 = vmov 0  }
 0x10f   :  { %2480 = vmatpush1.bf16.msra.mxu0 %v3562_v14 }
 0x110   :  { %2481 = vmatprep.subr.bf16.mxu0 %v3570_v15 }
 0x111   :  { %2521 = vmatpush1.bf16.msra.mxu1 %v3565_v16 }
 0x112   :  { %2522 = vmatprep.subr.bf16.mxu1 %v3573_v17 }
 0x113   :  { %2482 = vmatpush1.bf16.msra.mxu0 %v3568_v18 }
 0x114   :  { %2483 = vmatprep.subr.bf16.mxu0 %v3576_v19 }
 0x115   :  { %2523 = vmatpush1.bf16.msra.mxu1 %v3571_v20  ;;  %v491_v20 = vrot.slane %v476_v10, %v3850_v48  ;;  %v3650_v48 = vld [vmem:[%s4819_s3 + $0x30] sm:$0xff]  }
 0x116   :  { %2524 = vmatprep.subr.bf16.mxu1 %v3579_v21 }
 0x117   :  { %2484 = vmatpush1.bf16.msra.mxu0 %v3574_v22 }
 0x118   :  { %2485 = vmatprep.subr.bf16.mxu0 %v3582_v23 }
 0x119   :  { %2525 = vmatpush1.bf16.msra.mxu1 %v3577_v5  ;;  %v3647_v5 = vld [vmem:[%s4819_s3 + $0x78] sm:$0xff]  }
 0x11a   :  { %2526 = vmatprep.subr.bf16.mxu1 %v3585_v25  ;;  %v3649_v25 = vld [vmem:[%s4819_s3 + $0x70] sm:$0xff]  }
 0x11b   :  { %2486 = vmatpush1.bf16.msra.mxu0 %v3580_v26  ;;  %v3651_v26 = vld [vmem:[%s4819_s3 + $0x68] sm:$0xff]  }
 0x11c   :  { %2487 = vmatprep.subr.bf16.mxu0 %v3588_v27  ;;  %v3652_v27 = vld [vmem:[%s4819_s3 + $0x28] sm:$0xff]  }
 0x11d   :  { %2527 = vmatpush1.bf16.msra.mxu1 %v3583_v29  ;;  %v3653_v29 = vld [vmem:[%s4819_s3 + $0x60] sm:$0xff]  }
 0x11e   :  { %2528 = vmatprep.subr.bf16.mxu1 %v3591_v31  ;;  %v3654_v31 = vld [vmem:[%s4819_s3 + $0x20] sm:$0xff]  }
 0x11f   :  { %2488 = vmatpush1.bf16.msra.mxu0 %v3586_v32 }
 0x120   :  { %2489 = vmatprep.subr.bf16.mxu0 %v3594_v33 }
 0x121   :  { %2529 = vmatpush1.bf16.msra.mxu1 %v3589_v35 }
 0x122   :  { %2530 = vmatprep.subr.bf16.mxu1 %v3597_v36 }
 0x123   :  { %2490 = vmatpush2.bf16.msra.mxu0 %v3592_v28  ;;  %v3655_v28 = vld [vmem:[%s4819_s3 + $0x58] sm:$0xff]  }
 0x124   :  { %2491 = vmatprep.subr.bf16.mxu0 %v3600_v37 }
 0x125   :  { %2531 = vmatpush2.bf16.msra.mxu1 %v3595_v38 }
 0x126   :  { %2532 = vmatprep.subr.bf16.mxu1 %v3603_v39  ;;  %v3656_v39 = vld [vmem:[%s4819_s3 + $0x18] sm:$0xff]  }
 0x127   :  { %2492 = vmatpush2.bf16.msra.mxu0 %v3598_v40 }
 0x128   :  { %2493 = vmatprep.subr.bf16.mxu0 %v3606_v41 }
 0x129   :  { %2533 = vmatpush2.bf16.msra.mxu1 %v3601_v43 }
 0x12a   :  { %2534 = vmatprep.subr.bf16.mxu1 %v3609_v44 }
 0x12b   :  { %2494 = vmatpush2.bf16.msra.mxu0 %v3604_v45 }
 0x12c   :  { %2495 = vmatprep.subr.bf16.mxu0 %v3612_v46  ;;  %v3657_v46 = vld [vmem:[%s4819_s3 + $0x50] sm:$0xff]  }
 0x12d   :  { %2535 = vmatpush2.bf16.msra.mxu1 %v3607_v47  ;;  %v3658_v47 = vld [vmem:[%s4819_s3 + $0x10] sm:$0xff]  }
 0x12e   :  { %2536 = vmatprep.subr.bf16.mxu1 %v3615_v49 }
 0x12f   :  { %2496 = vmatpush2.bf16.msra.mxu0 %v3610_v50  ;;  %v3659_v50 = vld [vmem:[%s4819_s3 + $0x48] sm:$0xff]  }
 0x130   :  { %2497 = vmatprep.subr.bf16.mxu0 %v3618_v24  ;;  %v3660_v24 = vld [vmem:[%s4819_s3 + $0x8] sm:$0xff]  }
 0x131   :  { %2537 = vmatpush2.bf16.msra.mxu1 %v3613_v51  ;;  %v3661_v51 = vld [vmem:[%s4819_s3 + $0x40] sm:$0xff]  }
 0x132   :  { %2538 = vmatprep.subr.bf16.mxu1 %v3621_v52  ;;  %v3662_v52 = vld [vmem:[%s4819_s3] sm:$0xff]  }
 0x133   :  { %2498 = vmatpush2.bf16.msra.mxu0 %v3616_v53 }
 0x134   :  { %2499 = vmatprep.subr.bf16.mxu0 %v3624_v42 }
 0x135   :  { %2539 = vmatpush2.bf16.msra.mxu1 %v3619_v54 }
 0x136   :  { %2540 = vmatprep.subr.bf16.mxu1 %v3627_v55 }
 0x137   :  { %2500 = vmatpush2.bf16.msra.mxu0 %v3622_v56 }
 0x138   :  { %2501 = vmatprep.subr.bf16.mxu0 %v3630_v57 }
 0x139   :  { %2541 = vmatpush2.bf16.msra.mxu1 %v3625_v58 }
 0x13a   :  { %2542 = vmatprep.subr.bf16.mxu1 %v3633_v59 }
 0x13b   :  { %2502 = vmatpush2.bf16.msra.mxu0 %v3628_v60 }
 0x13c   :  { %2503 = vmatprep.subr.bf16.mxu0 %v3636_v61 }
 0x13d   :  { %2543 = vmatpush2.bf16.msra.mxu1 %v3631_v62 }
 0x13e   :  { %2544 = vmatprep.subr.bf16.mxu1 %v3639_v63 }
 0x13f   :  { %2504 = vmatpush2.bf16.msra.mxu0 %v3634_v1 }
 0x140   :  { %2567 = vmatprep.subr.bf16.mxu0 %v3643_v3 }
 0x141   :  { %2545 = vmatpush2.bf16.msra.mxu1 %v3637_v4 }
 0x142   :  { %v2261_v11 = vpop.f32.mrf.mxu0  ;;  %2506 = vmatmul.mubr.bf16.vlgmr.msra.gmra.mxu0 %v484_v2  ;;  %3133 = vmatprep.subr.bf16.mxu1 %v3647_v5 }
 0x143   :  { %v2262_v12 = vadd.f32 %v2261_v11, %v4570_v0  ;;  %2568 = vmatpush1.bf16.msra.mxu0 %v3641_v8  ;;  %2587 = vmatprep.mubr.bf16.mxu0 %v3686_v13 }
 0x144   :  { %2547 = vmatmul.mubr.bf16.vlgmr.msra.gmra.mxu1 %v499_v34  ;;  %v2263_v14 = vpop.f32.mrf.mxu0  ;;  %v2302_v15 = vpop.f32.mrf.mxu1  ;;  %2569 = vmatprep.subr.bf16.mxu0 %v3646_v9 }
 0x145   :  { %v2264_v16 = vadd.f32 %v2263_v14, %v4578_v6  ;;  %v2303_v17 = vadd.f32 %v2302_v15, %v2262_v12  ;;  %v3648_v6 = vld [vmem:[%s4819_s3 + $0x38] sm:$0xff]  }
 0x146   :  { %v2265_v18 = vpop.f32.mrf.mxu0  ;;  %v2304_v19 = vpop.f32.mrf.mxu1  ;;  %3134 = vmatpush3.bf16.msra.mxu1 %v3648_v6 }
 0x147   :  { %v2305_v21 = vadd.f32 %v2304_v19, %v2264_v16  ;;  %2570 = vmatpush1.bf16.msra.mxu0 %v3644_v30  ;;  %3135 = vmatprep.subr.bf16.mxu1 %v3649_v25 }
 0x148   :  { %v2266_v0 = vpop.f32.mrf.mxu0  ;;  %v2306_v22 = vpop.f32.mrf.mxu1 }
 0x14a   :  { %v2307_v23 = vpop.f32.mrf.mxu1  ;;  %3115 = vmatmul.mubr.msk.bf16.vlgmr.msra.gmra.mxu0 %vm2141_vm0, %v491_v20  ;;  %3136 = vmatpush3.bf16.msra.mxu1 %v3650_v48 }
 0x14b   :  { %3137 = vmatprep.subr.bf16.mxu1 %v3651_v26  ;;  %v3116_v23 = vld [vmem:[%s4820_s4] ss:$0 sm:$0xff] }
 0x14e   :  { %3138 = vmatpush3.bf16.msra.mxu1 %v3652_v27 }
 0x14f   :  { %3139 = vmatprep.subr.bf16.mxu1 %v3653_v29 }
 0x152   :  { %3140 = vmatpush3.bf16.msra.mxu1 %v3654_v31 }
 0x153   :  { %3141 = vmatprep.subr.bf16.mxu1 %v3655_v28 }
 0x156   :  { %3142 = vmatpush3.bf16.msra.mxu1 %v3656_v39 }
 0x157   :  { %3143 = vmatprep.subr.bf16.mxu1 %v3657_v46 }
 0x15a   :  { %3144 = vmatpush3.bf16.msra.mxu1 %v3658_v47 }
 0x15b   :  { %3145 = vmatprep.subr.bf16.mxu1 %v3659_v50 }
 0x15e   :  { %3146 = vmatpush3.bf16.msra.mxu1 %v3660_v24 }
 0x15f   :  { %3147 = vmatprep.subr.bf16.mxu1 %v3661_v51 }
 0x162   :  { %3148 = vmatpush3.bf16.msra.mxu1 %v3662_v52 }
 0x182   :  { %v2343_v32 = vpop.f32.mrf.mxu0 }
 0x183   :  { %v2344_v33 = vadd.f32 %v2343_v32, %v2303_v17 }
 0x184   :  { %v2345_v35 = vpop.f32.mrf.mxu0  ;;  %v2384_v36 = vpop.f32.mrf.mxu1 }
 0x185   :  { %v2346_v37 = vadd.f32 %v2345_v35, %v2305_v21  ;;  %v2385_v38 = vadd.f32 %v2384_v36, %v2344_v33 }
 0x186   :  { %v2347_v40 = vpop.f32.mrf.mxu0  ;;  %v2386_v41 = vpop.f32.mrf.mxu1 }
 0x187   :  { %v2387_v43 = vadd.f32 %v2386_v41, %v2346_v37 }
 0x188   :  { %v2348_v44 = vpop.f32.mrf.mxu0  ;;  %v2388_v45 = vpop.f32.mrf.mxu1 }
 0x18a   :  { %v2389_v49 = vpop.f32.mrf.mxu1 }
 0x1c2   :  { %v2425_v53 = vpop.f32.mrf.mxu0 }
 0x1c3   :  { %v2426_v42 = vadd.f32 %v2425_v53, %v2385_v38 }
 0x1c4   :  { %v2427_v54 = vpop.f32.mrf.mxu0  ;;  %v2466_v55 = vpop.f32.mrf.mxu1 }
 0x1c5   :  { %v2428_v56 = vadd.f32 %v2427_v54, %v2387_v43  ;;  %v2467_v57 = vadd.f32 %v2466_v55, %v2426_v42 }
 0x1c6   :  { %v2429_v58 = vpop.f32.mrf.mxu0  ;;  %v2468_v59 = vpop.f32.mrf.mxu1 }
 0x1c7   :  { %v2469_v60 = vadd.f32 %v2468_v59, %v2428_v56 }
 0x1c8   :  { %v2430_v61 = vpop.f32.mrf.mxu0  ;;  %v2470_v62 = vpop.f32.mrf.mxu1 }
 0x1ca   :  { %v2471_v63 = vpop.f32.mrf.mxu1 }
 0x202   :  { %v2507_v1 = vpop.f32.mrf.mxu0 }
 0x203   :  { %v2508_v4 = vadd.f32 %v2507_v1, %v2467_v57 }
 0x204   :  { %v2548_v2 = vpop.f32.mrf.mxu1  ;;  %v2509_v3 = vpop.f32.mrf.mxu0 }
 0x205   :  { %v2510_v34 = vadd.f32 %v2509_v3, %v2469_v60  ;;  %v2549_v11 = vadd.f32 %v2548_v2, %v2508_v4 }
 0x206   :  { %v2550_v7 = vpop.f32.mrf.mxu1  ;;  %v2511_v8 = vpop.f32.mrf.mxu0 }
 0x207   :  { %v2551_v13 = vadd.f32 %v2550_v7, %v2510_v34 }
 0x208   :  { %v2552_v9 = vpop.f32.mrf.mxu1  ;;  %v2512_v10 = vpop.f32.mrf.mxu0 }
 0x20a   :  { %v2553_v12 = vpop.f32.mrf.mxu1  ;;  %v2589_v30 = vpop.f32.mrf.mxu0 }
 0x20b   :  { %v2590_v14 = vadd.f32 %v2589_v30, %v2549_v11 }
 0x20c   :  { %v2591_v15 = vpop.f32.mrf.mxu0 }
 0x20d   :  { %v2592_v16 = vadd.f32 %v2591_v15, %v2551_v13  ;;  %v2596_v17 = vmax.f32 %v2590_v14, 0.0 }
 0x20e   :  { %v2593_v18 = vpop.f32.mrf.mxu0 }
 0x20f   :  { %v2597_v19 = vmax.f32 %v2592_v16, 0.0  ;;  %v2598_v0 = vpack.c.bf16 %v2596_v17, %v2596_v17 }
 0x210   :  { %v2594_v20 = vpop.f32.mrf.mxu0 }
 0x211   :  { %v2599_v21 = vpack.c.bf16 %v2597_v19, %v2597_v19 }
 0x213   :  { %2767 = vmatprep.mubr.bf16.mxu1 %v2599_v21 }
 0x214   :  { %2768 = vmatmul.mubr.bf16.vlgmr.msra.gmra.mxu1 %v2598_v0 }
 0x2d4   :  { %v3149_v22 = vpop.f32.mrf.mxu1 }
 0x2d6   :  { %v3150_v5 = vpop.f32.mrf.mxu1 }
 0x2d7   :  { %v3151_v6 = vadd.f32 %v3150_v5, %v3149_v22 }
 0x2d8   :  { %v3152_v25 = vpop.f32.mrf.mxu1 }
 0x2d9   :  { %v2770_v48 = vadd.f32 %v3151_v6, %v3116_v23 }
 0x2da   :  { %v3153_v26 = vpop.f32.mrf.mxu1 }
 0x2db   :  { %2776 = vst.msk [vmem:[#allocation2] sm:$0x3] %vm2775_vm1, %v2770_v48 }
 0x2dc   :  { %3674 = shalt.err (!%p3671_p4)
}
 0x2dd   :  { %2786 = dma.vmem_to_hbm [thread:$0]  %s2784_s17, 32, %s4821_s5, [#allocation3]  }
 0x2de   :  { %3683 = dma.done.wait [#allocation3], 32  }
 0x2df   :  { %3684 = vsyncadd [#allocation3], 4294967264 }
 0x2e0   :  { %2790 = vsyncpa [#allocation3], 1 }

</bundles_post_ra>
